<compile_context>
chip_gen: v6e
topology: v6e:2x2x1
jax: 0.10.0
libtpu: 0.0.40
codegen_flags: <defaults>
</compile_context>

<pallas_src>
import functools
import math
import numpy as np
import jax
import jax.numpy as jnp
from jax.experimental import pallas as pl
from jax.experimental.pallas import tpu as pltpu

LANE = 128
SUBLANE = 8


def _round_up(x, m):
    return ((x + m - 1) // m) * m


def _pad2d(a, rows, cols, value=0.0):
    a = jnp.asarray(a)
    return jnp.pad(a, ((0, rows - a.shape[0]), (0, cols - a.shape[1])),
                   constant_values=value)


# ----------------------------------------------------------------------------
# Kernel
# ----------------------------------------------------------------------------
def make_dcn_kernel(num_cross_layers, num_deep_layers):
    """DCN forward on one (TB, D) batch tile.

    Ref order (parameters use constant index maps -> VMEM-resident):
      x0            (TB, D)              f32   activation tile (unpadded width)
      cross_W       (L, D)               f32
      cross_scale   (L, D)               f32   folded BN gamma/sqrt(var+eps)
      cross_shift   (L, D)               f32   folded bias*scale + BN shift
      [W'_k (Kin, Hk_pad) bf16, b'_k (1, Hk_pad) f32] * num_deep_layers
      fc_w_cross    (1, D)               f32
      fc_w_deep     (1, H_last_pad)      f32
      fc_b          (1,)                 f32   SMEM scalar
      out           (TB, 1)              f32
    """

    def kernel(*refs):
        x0_ref = refs[0]
        cw_ref, cs_ref, ct_ref = refs[1:4]
        deep_refs = refs[4:4 + 2 * num_deep_layers]
        fcw_c_ref, fcw_d_ref, fcb_ref = refs[4 + 2 * num_deep_layers:
                                             7 + 2 * num_deep_layers]
        out_ref = refs[-1]

        x0 = x0_ref[...]                                  # (TB, D) f32

        # ---------------- cross network (VPU + XLU lane reduce) --------------
        cW = cw_ref[...]
        cS = cs_ref[...]
        cT = ct_ref[...]
        x_cross = x0
        for i in range(num_cross_layers):
            w_i = cW[i:i + 1, :]                                    # (1, D)
            xT_w = jnp.sum(x_cross * w_i, axis=1, keepdims=True)    # (TB, 1)
            # cross bias + eval-mode BatchNorm folded into scale/shift.
            x_cross = (x0 * xT_w + x_cross) * cS[i:i + 1, :] + cT[i:i + 1, :]

        # ---------------- deep network (bf16 MXU, f32 accumulate) ------------
        # bf16 cast hoisted: cast once, keep activation bf16 between layers.
        x_act = x0.astype(jnp.bfloat16)
        x_deep = None
        for k in range(num_deep_layers):
            w_ref, b_ref = deep_refs[2 * k:2 * k + 2]
            y = jnp.dot(x_act, w_ref[...], preferred_element_type=jnp.float32)
            y = jnp.maximum(y + b_ref[...], 0.0)   # bias (BN folded, f32) + ReLU
            if k + 1 < num_deep_layers:
                x_act = y.astype(jnp.bfloat16)     # dropout = identity (eval)
            else:
                x_deep = y                         # keep f32 for the epilogue

        # ---------------- final fc: VPU multiply + lane reduction ------------
        out = (jnp.sum(x_cross * fcw_c_ref[...], axis=1, keepdims=True)
               + jnp.sum(x_deep * fcw_d_ref[...], axis=1, keepdims=True)
               + fcb_ref[0])                       # scalar bias from SMEM
        out_ref[...] = out

    return kernel


# ----------------------------------------------------------------------------
# Parameter building / folding / padding (done once, outside the jitted path)
# ----------------------------------------------------------------------------
def xavier_uniform(key, shape, fan_in, fan_out, dtype=jnp.float32):
    bound = math.sqrt(6.0 / (fan_in + fan_out))
    return jax.random.uniform(key, shape, dtype, minval=-bound, maxval=bound)


def fold_bn(gamma, beta, running_mean, running_var, eps=1e-5):
    scale = gamma / jnp.sqrt(running_var + eps)
    shift = beta - running_mean * scale
    return scale, shift


def build_params(key, num_dense_feat, num_sparse_feat_list, deep_layer_sizes,
                 num_cross_layers):
    keys = jax.random.split(key, 32)
    ki = iter(keys)

    embeddings = []
    embedding_sizes = []
    for n_sparse in num_sparse_feat_list:
        emb_dim = min(n_sparse, 6 * int(np.power(n_sparse, 1 / 4)))
        embedding_sizes.append(emb_dim)
        embeddings.append(xavier_uniform(next(ki), (n_sparse, emb_dim),
                                         n_sparse, emb_dim))

    input_dim = num_dense_feat + sum(embedding_sizes)

    cross_W = xavier_uniform(next(ki), (num_cross_layers, input_dim),
                             num_cross_layers, input_dim)
    cross_bias = jnp.zeros((num_cross_layers, input_dim), jnp.float32)
    # BatchNorm1d fresh init: gamma=1, beta=0, running_mean=0, running_var=1
    cross_gamma = jnp.ones((num_cross_layers, input_dim), jnp.float32)
    cross_beta = jnp.zeros((num_cross_layers, input_dim), jnp.float32)
    cross_rmean = jnp.zeros((num_cross_layers, input_dim), jnp.float32)
    cross_rvar = jnp.ones((num_cross_layers, input_dim), jnp.float32)

    all_dims = [input_dim] + list(deep_layer_sizes)
    deep = []
    for i in range(len(deep_layer_sizes)):
        fi, fo = all_dims[i], all_dims[i + 1]
        w = xavier_uniform(next(ki), (fi, fo), fi, fo)          # stored (in, out)
        b = jax.random.uniform(next(ki), (fo,), jnp.float32,
                               minval=-1.0 / math.sqrt(fi),
                               maxval=1.0 / math.sqrt(fi))
        g = jnp.ones((fo,), jnp.float32)
        bt = jnp.zeros((fo,), jnp.float32)
        rm = jnp.zeros((fo,), jnp.float32)
        rv = jnp.ones((fo,), jnp.float32)
        deep.append((w, b, g, bt, rm, rv))

    fc_in = input_dim + all_dims[-1]
    fc_w = xavier_uniform(next(ki), (fc_in, 1), fc_in, 1)
    fc_b = jax.random.uniform(next(ki), (1, 1), jnp.float32,
                              minval=-1.0 / math.sqrt(fc_in),
                              maxval=1.0 / math.sqrt(fc_in))

    return {
        "embeddings": embeddings,
        "cross_W": cross_W, "cross_bias": cross_bias,
        "cross_gamma": cross_gamma, "cross_beta": cross_beta,
        "cross_rmean": cross_rmean, "cross_rvar": cross_rvar,
        "deep": deep,
        "fc_w": fc_w, "fc_b": fc_b,
    }, input_dim


def prepare_kernel_params(params):
    """Host-side, once per model: fold BN into linear params.

    Only the *parameter* hidden dims are padded to 128 lanes; activation width
    D stays unpadded (the kernel input block uses the full last dim).
    """
    input_dim = params["cross_W"].shape[1]

    cross_scale, cross_shift = fold_bn(params["cross_gamma"], params["cross_beta"],
                                       params["cross_rmean"], params["cross_rvar"])
    # (x + bias)*s + t  ==  x*s + (bias*s + t)
    cross_shift = params["cross_bias"] * cross_scale + cross_shift

    deep = []
    in_dim = input_dim                       # layer-0 K == unpadded x0 width
    for (w, b, g, bt, rm, rv) in params["deep"]:
        s, t = fold_bn(g, bt, rm, rv)
        # NOTE: BN scale folded into the bf16 weight.  With tiny running_var
        # this amplifies bf16 rounding; if accuracy regresses, apply the BN
        # scale in f32 post-matmul instead.
        w_f = w * s
        b_f = (b * s + t).reshape(1, -1)
        out_pad = _round_up(w.shape[1], LANE)
        w_f = _pad2d(w_f, in_dim, out_pad, 0.0).astype(jnp.bfloat16)
        b_f = _pad2d(b_f, 1, out_pad, 0.0)
        deep.append((w_f, b_f))
        in_dim = out_pad

    H_last_pad = in_dim
    fc_w = params["fc_w"]                              # (input_dim + H_last, 1)
    fc_w_cross = fc_w[:input_dim].T                    # (1, D), unpadded
    fc_w_deep = _pad2d(fc_w[input_dim:].T, 1, H_last_pad, 0.0)
    fc_b = params["fc_b"].reshape((1,))                # SMEM scalar

    return dict(embeddings=params["embeddings"],
                cross_W=params["cross_W"],
                cross_scale=cross_scale, cross_shift=cross_shift,
                deep=deep,
                fc_w_cross=fc_w_cross, fc_w_deep=fc_w_deep, fc_b=fc_b)


# ----------------------------------------------------------------------------
# Wrapper (jit this whole function)
# ----------------------------------------------------------------------------
def dcn_forward_pallas(feat_index_list, dense_x, kp, *,
                       batch_tile=1024, vmem_limit_bytes=32 * 1024 * 1024):
    # ---- embedding gather + concat (XLA glue, fused under jit) --------------
    # TODO(synk): fuse the gather into the kernel (one-hot matmul with the
    # small embedding tables VMEM-resident, or scalar-prefetch DMA gather) to
    # drop the HBM write+read of x0.
    x0 = dense_x
    for idx, emb_w in zip(feat_index_list, kp["embeddings"]):
        x0 = jnp.concatenate([x0, jnp.take(emb_w, idx, axis=0)], axis=1)

    B, D = x0.shape
    assert D == kp["cross_W"].shape[1]

    num_cross = kp["cross_W"].shape[0]
    num_deep = len(kp["deep"])
    assert num_deep >= 1

    # ---- batch tiling --------------------------------------------------------
    # As large as possible (per-grid-step overhead ~0.35us), but always >= 2
    # (even) tiles when B allows so the "parallel" batch axis can shard across
    # both v7x TensorCores.  x0 is NOT padded: the ragged last tile's OOB rows
    # stay confined to their own (masked) output rows.
    if B <= SUBLANE:
        TB = SUBLANE
    else:
        n_tiles = max(2, -(-B // batch_tile))
        if n_tiles % 2:
            n_tiles += 1
        TB = _round_up(-(-B // n_tiles), SUBLANE)
    grid = (pl.cdiv(B, TB),)

    kernel = make_dcn_kernel(num_cross, num_deep)

    inputs = [x0, kp["cross_W"], kp["cross_scale"], kp["cross_shift"]]
    for (w, b) in kp["deep"]:
        inputs += [w, b]
    inputs += [kp["fc_w_cross"], kp["fc_w_deep"], kp["fc_b"]]

    def const_spec(a):
        nd = a.ndim
        return pl.BlockSpec(tuple(a.shape), lambda b, _nd=nd: (0,) * _nd)

    in_specs = [pl.BlockSpec((TB, D), lambda b: (b, 0))]          # activation tile
    in_specs += [const_spec(a) for a in inputs[1:-1]]             # resident params
    in_specs += [pl.BlockSpec(memory_space=pltpu.MemorySpace.SMEM)]  # fc_b scalar
    out_specs = pl.BlockSpec((TB, 1), lambda b: (b, 0))

    out = pl.pallas_call(
        kernel,
        out_shape=jax.ShapeDtypeStruct((B, 1), jnp.float32),
        grid=grid,
        in_specs=in_specs,
        out_specs=out_specs,
        compiler_params=pltpu.CompilerParams(
            dimension_semantics=("parallel",),       # shard batch tiles across TCs
            vmem_limit_bytes=vmem_limit_bytes),
    )(*inputs)
    return out


# ----------------------------------------------------------------------------
# Pure-JAX reference (eval-mode semantics, f32 throughout)
# ----------------------------------------------------------------------------
def dcn_forward_ref(feat_index_list, dense_x, params):
    x0 = dense_x
    for idx, emb_w in zip(feat_index_list, params["embeddings"]):
        x0 = jnp.concatenate([x0, jnp.take(emb_w, idx, axis=0)], axis=1)
    x0 = x0.astype(jnp.float32)

    cs, ct = fold_bn(params["cross_gamma"], params["cross_beta"],
                     params["cross_rmean"], params["cross_rvar"])
    x_cross = x0
    for i in range(params["cross_W"].shape[0]):
        xT_w = x_cross @ params["cross_W"][i][:, None]            # (B, 1)
        x_cross = x0 * xT_w + params["cross_bias"][i] + x_cross
        x_cross = x_cross * cs[i] + ct[i]

    x_deep = x0
    for (w, b, g, bt, rm, rv) in params["deep"]:
        s, t = fold_bn(g, bt, rm, rv)
        x_deep = x_deep @ w + b
        x_deep = x_deep * s + t
        x_deep = jnp.maximum(x_deep, 0.0)

    x_stack = jnp.concatenate([x_cross, x_deep], axis=1)
    return x_stack @ params["fc_w"] + params["fc_b"]


# ----------------------------------------------------------------------------
if __name__ == "__main__":
    batch = 300                         # exercises 2 batch tiles + a ragged tail
    num_dense_feat = 14
    num_sparse_feat_list = [10, 50]     # emb dims -> 6, 12  => input_dim = 32
    deep_layer_sizes = [64, 32]
    num_cross_layers = 4

    key = jax.random.PRNGKey(0)
    kparam, kdense, k0, k1 = jax.random.split(key, 4)

    params, input_dim = build_params(kparam, num_dense_feat, num_sparse_feat_list,
                                     deep_layer_sizes, num_cross_layers)

    dense_x = jax.random.normal(kdense, (batch, num_dense_feat), jnp.float32)
    feat_index_list = [
        jax.random.randint(k0, (batch,), 0, num_sparse_feat_list[0]),
        jax.random.randint(k1, (batch,), 0, num_sparse_feat_list[1]),
    ]

    # Fold/pad parameters once (hoisted out of the per-call path), jit forward.
    kp = prepare_kernel_params(params)
    dcn_forward = jax.jit(functools.partial(dcn_forward_pallas, batch_tile=1024))

    out = dcn_forward(feat_index_list, dense_x, kp)
    out = jax.block_until_ready(out)

    ref = jax.block_until_ready(dcn_forward_ref(feat_index_list, dense_x, params))

    assert out.shape == (batch, 1), out.shape
    # bf16 MXU matmuls change rounding order vs the f32 reference.
    np.testing.assert_allclose(np.asarray(out), np.asarray(ref),
                               rtol=2e-2, atol=2e-2)
    print("KERNEL_OK")
</pallas_src>

<mosaic_0001>
module attributes {stable_mosaic.version = 11 : i64} {
  func.func @kernel(%arg0: i32, %arg1: memref<152x32xf32, #tpu.memory_space<vmem>>, %arg2: memref<4x32xf32, #tpu.memory_space<vmem>>, %arg3: memref<4x32xf32, #tpu.memory_space<vmem>>, %arg4: memref<4x32xf32, #tpu.memory_space<vmem>>, %arg5: memref<32x128xbf16, #tpu.memory_space<vmem>>, %arg6: memref<1x128xf32, #tpu.memory_space<vmem>>, %arg7: memref<128x128xbf16, #tpu.memory_space<vmem>>, %arg8: memref<1x128xf32, #tpu.memory_space<vmem>>, %arg9: memref<1x32xf32, #tpu.memory_space<vmem>>, %arg10: memref<1x128xf32, #tpu.memory_space<vmem>>, %arg11: memref<1xf32, #tpu.memory_space<smem>>, %arg12: memref<152x1xf32, #tpu.memory_space<vmem>>) attributes {dimension_semantics = [#tpu.dimension_semantics<parallel>], iteration_bounds = array<i64: 2>, scalar_prefetch = 0 : i64, scratch_operands = 0 : i64, tpu.core_type = #tpu.core_type<tc>, window_params = [{transform_indices = @transform_0, window_bounds = array<i64: 152, 32>}, {pipeline_mode = #tpu.pipeline_mode<synchronous>, transform_indices = @transform_1, window_bounds = array<i64: 4, 32>}, {pipeline_mode = #tpu.pipeline_mode<synchronous>, transform_indices = @transform_2, window_bounds = array<i64: 4, 32>}, {pipeline_mode = #tpu.pipeline_mode<synchronous>, transform_indices = @transform_3, window_bounds = array<i64: 4, 32>}, {pipeline_mode = #tpu.pipeline_mode<synchronous>, transform_indices = @transform_4, window_bounds = array<i64: 32, 128>}, {pipeline_mode = #tpu.pipeline_mode<synchronous>, transform_indices = @transform_5, window_bounds = array<i64: 1, 128>}, {pipeline_mode = #tpu.pipeline_mode<synchronous>, transform_indices = @transform_6, window_bounds = array<i64: 128, 128>}, {pipeline_mode = #tpu.pipeline_mode<synchronous>, transform_indices = @transform_7, window_bounds = array<i64: 1, 128>}, {pipeline_mode = #tpu.pipeline_mode<synchronous>, transform_indices = @transform_8, window_bounds = array<i64: 1, 32>}, {pipeline_mode = #tpu.pipeline_mode<synchronous>, transform_indices = @transform_9, window_bounds = array<i64: 1, 128>}, {transform_indices = @transform_10, window_bounds = array<i64: 1>}, {transform_indices = @transform_11, window_bounds = array<i64: 152, 1>}]} {
    %c0 = arith.constant 0 : index
    %c0_0 = arith.constant 0 : index
    %0 = vector.load %arg1[%c0, %c0_0] : memref<152x32xf32, #tpu.memory_space<vmem>>, vector<152x32xf32>
    %c0_1 = arith.constant 0 : index
    %c0_2 = arith.constant 0 : index
    %1 = vector.load %arg2[%c0_1, %c0_2] : memref<4x32xf32, #tpu.memory_space<vmem>>, vector<4x32xf32>
    %c0_3 = arith.constant 0 : index
    %c0_4 = arith.constant 0 : index
    %2 = vector.load %arg3[%c0_3, %c0_4] : memref<4x32xf32, #tpu.memory_space<vmem>>, vector<4x32xf32>
    %c0_5 = arith.constant 0 : index
    %c0_6 = arith.constant 0 : index
    %3 = vector.load %arg4[%c0_5, %c0_6] : memref<4x32xf32, #tpu.memory_space<vmem>>, vector<4x32xf32>
    %4 = vector.extract_strided_slice %1 {offsets = [0, 0], sizes = [1, 32], strides = [1, 1]} : vector<4x32xf32> to vector<1x32xf32>
    %5 = vector.broadcast %4 : vector<1x32xf32> to vector<152x32xf32>
    %6 = arith.mulf %0, %5 : vector<152x32xf32>
    %cst = arith.constant dense<0.000000e+00> : vector<152xf32>
    %7 = vector.multi_reduction <add>, %6, %cst [1] : vector<152x32xf32> to vector<152xf32>
    %8 = vector.shape_cast %7 : vector<152xf32> to vector<152x1xf32>
    %9 = vector.broadcast %8 : vector<152x1xf32> to vector<152x32xf32>
    %10 = arith.mulf %0, %9 : vector<152x32xf32>
    %11 = arith.addf %10, %0 : vector<152x32xf32>
    %12 = vector.extract_strided_slice %2 {offsets = [0, 0], sizes = [1, 32], strides = [1, 1]} : vector<4x32xf32> to vector<1x32xf32>
    %13 = vector.broadcast %12 : vector<1x32xf32> to vector<152x32xf32>
    %14 = arith.mulf %11, %13 : vector<152x32xf32>
    %15 = vector.extract_strided_slice %3 {offsets = [0, 0], sizes = [1, 32], strides = [1, 1]} : vector<4x32xf32> to vector<1x32xf32>
    %16 = vector.broadcast %15 : vector<1x32xf32> to vector<152x32xf32>
    %17 = arith.addf %14, %16 : vector<152x32xf32>
    %18 = vector.extract_strided_slice %1 {offsets = [1, 0], sizes = [1, 32], strides = [1, 1]} : vector<4x32xf32> to vector<1x32xf32>
    %19 = vector.broadcast %18 : vector<1x32xf32> to vector<152x32xf32>
    %20 = arith.mulf %17, %19 : vector<152x32xf32>
    %cst_7 = arith.constant dense<0.000000e+00> : vector<152xf32>
    %21 = vector.multi_reduction <add>, %20, %cst_7 [1] : vector<152x32xf32> to vector<152xf32>
    %22 = vector.shape_cast %21 : vector<152xf32> to vector<152x1xf32>
    %23 = vector.broadcast %22 : vector<152x1xf32> to vector<152x32xf32>
    %24 = arith.mulf %0, %23 : vector<152x32xf32>
    %25 = arith.addf %24, %17 : vector<152x32xf32>
    %26 = vector.extract_strided_slice %2 {offsets = [1, 0], sizes = [1, 32], strides = [1, 1]} : vector<4x32xf32> to vector<1x32xf32>
    %27 = vector.broadcast %26 : vector<1x32xf32> to vector<152x32xf32>
    %28 = arith.mulf %25, %27 : vector<152x32xf32>
    %29 = vector.extract_strided_slice %3 {offsets = [1, 0], sizes = [1, 32], strides = [1, 1]} : vector<4x32xf32> to vector<1x32xf32>
    %30 = vector.broadcast %29 : vector<1x32xf32> to vector<152x32xf32>
    %31 = arith.addf %28, %30 : vector<152x32xf32>
    %32 = vector.extract_strided_slice %1 {offsets = [2, 0], sizes = [1, 32], strides = [1, 1]} : vector<4x32xf32> to vector<1x32xf32>
    %33 = vector.broadcast %32 : vector<1x32xf32> to vector<152x32xf32>
    %34 = arith.mulf %31, %33 : vector<152x32xf32>
    %cst_8 = arith.constant dense<0.000000e+00> : vector<152xf32>
    %35 = vector.multi_reduction <add>, %34, %cst_8 [1] : vector<152x32xf32> to vector<152xf32>
    %36 = vector.shape_cast %35 : vector<152xf32> to vector<152x1xf32>
    %37 = vector.broadcast %36 : vector<152x1xf32> to vector<152x32xf32>
    %38 = arith.mulf %0, %37 : vector<152x32xf32>
    %39 = arith.addf %38, %31 : vector<152x32xf32>
    %40 = vector.extract_strided_slice %2 {offsets = [2, 0], sizes = [1, 32], strides = [1, 1]} : vector<4x32xf32> to vector<1x32xf32>
    %41 = vector.broadcast %40 : vector<1x32xf32> to vector<152x32xf32>
    %42 = arith.mulf %39, %41 : vector<152x32xf32>
    %43 = vector.extract_strided_slice %3 {offsets = [2, 0], sizes = [1, 32], strides = [1, 1]} : vector<4x32xf32> to vector<1x32xf32>
    %44 = vector.broadcast %43 : vector<1x32xf32> to vector<152x32xf32>
    %45 = arith.addf %42, %44 : vector<152x32xf32>
    %46 = vector.extract_strided_slice %1 {offsets = [3, 0], sizes = [1, 32], strides = [1, 1]} : vector<4x32xf32> to vector<1x32xf32>
    %47 = vector.broadcast %46 : vector<1x32xf32> to vector<152x32xf32>
    %48 = arith.mulf %45, %47 : vector<152x32xf32>
    %cst_9 = arith.constant dense<0.000000e+00> : vector<152xf32>
    %49 = vector.multi_reduction <add>, %48, %cst_9 [1] : vector<152x32xf32> to vector<152xf32>
    %50 = vector.shape_cast %49 : vector<152xf32> to vector<152x1xf32>
    %51 = vector.broadcast %50 : vector<152x1xf32> to vector<152x32xf32>
    %52 = arith.mulf %0, %51 : vector<152x32xf32>
    %53 = arith.addf %52, %45 : vector<152x32xf32>
    %54 = vector.extract_strided_slice %2 {offsets = [3, 0], sizes = [1, 32], strides = [1, 1]} : vector<4x32xf32> to vector<1x32xf32>
    %55 = vector.broadcast %54 : vector<1x32xf32> to vector<152x32xf32>
    %56 = arith.mulf %53, %55 : vector<152x32xf32>
    %57 = vector.extract_strided_slice %3 {offsets = [3, 0], sizes = [1, 32], strides = [1, 1]} : vector<4x32xf32> to vector<1x32xf32>
    %58 = vector.broadcast %57 : vector<1x32xf32> to vector<152x32xf32>
    %59 = arith.addf %56, %58 : vector<152x32xf32>
    %60 = arith.truncf %0 : vector<152x32xf32> to vector<152x32xbf16>
    %c0_10 = arith.constant 0 : index
    %c0_11 = arith.constant 0 : index
    %61 = vector.load %arg5[%c0_10, %c0_11] : memref<32x128xbf16, #tpu.memory_space<vmem>>, vector<32x128xbf16>
    %cst_12 = arith.constant dense<0.000000e+00> : vector<152x128xf32>
    %62 = tpu.matmul %60, %61, %cst_12 {dimension_numbers = #tpu.dot_dimension_numbers<[1], [0], [0], [1], [0, 0, 1, 1], [], []>} : vector<152x32xbf16>, vector<32x128xbf16>, vector<152x128xf32> -> vector<152x128xf32>
    %c0_13 = arith.constant 0 : index
    %c0_14 = arith.constant 0 : index
    %63 = vector.load %arg6[%c0_13, %c0_14] : memref<1x128xf32, #tpu.memory_space<vmem>>, vector<1x128xf32>
    %64 = vector.broadcast %63 : vector<1x128xf32> to vector<152x128xf32>
    %65 = arith.addf %62, %64 : vector<152x128xf32>
    %cst_15 = arith.constant 0.000000e+00 : f32
    %66 = vector.broadcast %cst_15 : f32 to vector<152x128xf32>
    %67 = arith.maximumf %65, %66 : vector<152x128xf32>
    %68 = arith.truncf %67 : vector<152x128xf32> to vector<152x128xbf16>
    %c0_16 = arith.constant 0 : index
    %c0_17 = arith.constant 0 : index
    %69 = vector.load %arg7[%c0_16, %c0_17] : memref<128x128xbf16, #tpu.memory_space<vmem>>, vector<128x128xbf16>
    %cst_18 = arith.constant dense<0.000000e+00> : vector<152x128xf32>
    %70 = tpu.matmul %68, %69, %cst_18 {dimension_numbers = #tpu.dot_dimension_numbers<[1], [0], [0], [1], [0, 0, 1, 1], [], []>} : vector<152x128xbf16>, vector<128x128xbf16>, vector<152x128xf32> -> vector<152x128xf32>
    %c0_19 = arith.constant 0 : index
    %c0_20 = arith.constant 0 : index
    %71 = vector.load %arg8[%c0_19, %c0_20] : memref<1x128xf32, #tpu.memory_space<vmem>>, vector<1x128xf32>
    %72 = vector.broadcast %71 : vector<1x128xf32> to vector<152x128xf32>
    %73 = arith.addf %70, %72 : vector<152x128xf32>
    %cst_21 = arith.constant 0.000000e+00 : f32
    %74 = vector.broadcast %cst_21 : f32 to vector<152x128xf32>
    %75 = arith.maximumf %73, %74 : vector<152x128xf32>
    %c0_22 = arith.constant 0 : index
    %c0_23 = arith.constant 0 : index
    %76 = vector.load %arg9[%c0_22, %c0_23] : memref<1x32xf32, #tpu.memory_space<vmem>>, vector<1x32xf32>
    %77 = vector.broadcast %76 : vector<1x32xf32> to vector<152x32xf32>
    %78 = arith.mulf %59, %77 : vector<152x32xf32>
    %cst_24 = arith.constant dense<0.000000e+00> : vector<152xf32>
    %79 = vector.multi_reduction <add>, %78, %cst_24 [1] : vector<152x32xf32> to vector<152xf32>
    %80 = vector.shape_cast %79 : vector<152xf32> to vector<152x1xf32>
    %c0_25 = arith.constant 0 : index
    %c0_26 = arith.constant 0 : index
    %81 = vector.load %arg10[%c0_25, %c0_26] : memref<1x128xf32, #tpu.memory_space<vmem>>, vector<1x128xf32>
    %82 = vector.broadcast %81 : vector<1x128xf32> to vector<152x128xf32>
    %83 = arith.mulf %75, %82 : vector<152x128xf32>
    %cst_27 = arith.constant dense<0.000000e+00> : vector<152xf32>
    %84 = vector.multi_reduction <add>, %83, %cst_27 [1] : vector<152x128xf32> to vector<152xf32>
    %85 = vector.shape_cast %84 : vector<152xf32> to vector<152x1xf32>
    %86 = arith.addf %80, %85 : vector<152x1xf32>
    %c0_28 = arith.constant 0 : index
    %87 = memref.load %arg11[%c0_28] : memref<1xf32, #tpu.memory_space<smem>>
    %88 = vector.broadcast %87 : f32 to vector<152x1xf32>
    %89 = arith.addf %86, %88 : vector<152x1xf32>
    %c0_29 = arith.constant 0 : index
    %c0_30 = arith.constant 0 : index
    %90 = vector.load %arg12[%c0_29, %c0_30] : memref<152x1xf32, #tpu.memory_space<vmem>>, vector<152x1xf32>
    tpu.vector_store %arg12[%c0_29, %c0_30], %89 {strides = array<i32>} : memref<152x1xf32, #tpu.memory_space<vmem>>, vector<152x1xf32>,
    return
  }
  func.func @transform_0(%arg0: i32) -> (i32, i32) {
    %c0_i32 = arith.constant 0 : i32
    %c0_i32_0 = arith.constant 0 : i32
    return %arg0, %c0_i32 : i32, i32
  }
  func.func @transform_1(%arg0: i32) -> (i32, i32) {
    %c0_i32 = arith.constant 0 : i32
    %c0_i32_0 = arith.constant 0 : i32
    %c0_i32_1 = arith.constant 0 : i32
    return %c0_i32, %c0_i32_0 : i32, i32
  }
  func.func @transform_2(%arg0: i32) -> (i32, i32) {
    %c0_i32 = arith.constant 0 : i32
    %c0_i32_0 = arith.constant 0 : i32
    %c0_i32_1 = arith.constant 0 : i32
    return %c0_i32, %c0_i32_0 : i32, i32
  }
  func.func @transform_3(%arg0: i32) -> (i32, i32) {
    %c0_i32 = arith.constant 0 : i32
    %c0_i32_0 = arith.constant 0 : i32
    %c0_i32_1 = arith.constant 0 : i32
    return %c0_i32, %c0_i32_0 : i32, i32
  }
  func.func @transform_4(%arg0: i32) -> (i32, i32) {
    %c0_i32 = arith.constant 0 : i32
    %c0_i32_0 = arith.constant 0 : i32
    %c0_i32_1 = arith.constant 0 : i32
    return %c0_i32, %c0_i32_0 : i32, i32
  }
  func.func @transform_5(%arg0: i32) -> (i32, i32) {
    %c0_i32 = arith.constant 0 : i32
    %c0_i32_0 = arith.constant 0 : i32
    %c0_i32_1 = arith.constant 0 : i32
    return %c0_i32, %c0_i32_0 : i32, i32
  }
  func.func @transform_6(%arg0: i32) -> (i32, i32) {
    %c0_i32 = arith.constant 0 : i32
    %c0_i32_0 = arith.constant 0 : i32
    %c0_i32_1 = arith.constant 0 : i32
    return %c0_i32, %c0_i32_0 : i32, i32
  }
  func.func @transform_7(%arg0: i32) -> (i32, i32) {
    %c0_i32 = arith.constant 0 : i32
    %c0_i32_0 = arith.constant 0 : i32
    %c0_i32_1 = arith.constant 0 : i32
    return %c0_i32, %c0_i32_0 : i32, i32
  }
  func.func @transform_8(%arg0: i32) -> (i32, i32) {
    %c0_i32 = arith.constant 0 : i32
    %c0_i32_0 = arith.constant 0 : i32
    %c0_i32_1 = arith.constant 0 : i32
    return %c0_i32, %c0_i32_0 : i32, i32
  }
  func.func @transform_9(%arg0: i32) -> (i32, i32) {
    %c0_i32 = arith.constant 0 : i32
    %c0_i32_0 = arith.constant 0 : i32
    %c0_i32_1 = arith.constant 0 : i32
    return %c0_i32, %c0_i32_0 : i32, i32
  }
  func.func @transform_10(%arg0: i32) -> i32 {
    %c0_i32 = arith.constant 0 : i32
    %c0_i32_0 = arith.constant 0 : i32
    return %c0_i32 : i32
  }
  func.func @transform_11(%arg0: i32) -> (i32, i32) {
    %c0_i32 = arith.constant 0 : i32
    %c0_i32_0 = arith.constant 0 : i32
    return %arg0, %c0_i32 : i32, i32
  }
}

</mosaic_0001>

<bundles_post_ra>
// kernel: dcn_forward_pallas.1
= control target key start
LH: loop header
LB: loop body
LE: loop exit
PB: predicated region body
PF: predicated region fallthrough
CT: control target
= control target key end

     0   :  { %s1990_s19 = smov 0   ;;  %s3149_s0 = inlined_call_operand.vmem [shape: f32[300,32], index: 0, kind: input, shape index: {}]   ;;  %s3150_s1 = inlined_call_operand.vmem [shape: f32[4,32], index: 1, kind: input, shape index: {}]   ;;  %s3151_s2 = inlined_call_operand.vmem [shape: f32[4,32], index: 2, kind: input, shape index: {}]   ;;  %s3152_s3 = inlined_call_operand.vmem [shape: f32[4,32], index: 3, kind: input, shape index: {}]   ;;  %s3153_s4 = inlined_call_operand.vmem [shape: bf16[32,128], index: 4, kind: input, shape index: {}]   ;;  %s3154_s5 = inlined_call_operand.vmem [shape: f32[1,128], index: 5, kind: input, shape index: {}]   ;;  %s3155_s6 = inlined_call_operand.vmem [shape: bf16[128,128], index: 6, kind: input, shape index: {}]   ;;  %s3156_s7 = inlined_call_operand.vmem [shape: f32[1,128], index: 7, kind: input, shape index: {}]   ;;  %s3157_s8 = inlined_call_operand.vmem [shape: f32[1,32], index: 8, kind: input, shape index: {}]   ;;  %s3158_s9 = inlined_call_operand.vmem [shape: f32[1,128], index: 9, kind: input, shape index: {}]   ;;  %s3159_s10 = inlined_call_operand.<no memory space> [shape: f32[1], index: 10, kind: input, shape index: {}]   ;;  %s3160_s11 = inlined_call_operand.vmem [shape: f32[300,1], index: 11, kind: output, shape index: {}]  }
   0x1   :  { %16 = sst [smem:[#allocation2]] %s3159_s10 }
   0x2 LB: > { %s1740_s20 = sadd.s32 4294967295, %s1925_s19   ;;  %p1744_p0 = scmp.ge.s32.totalorder %s1925_s19, 1  ;;  %s1925_s19 = sphi %s1990_s19, %s22_s19  }
   0x3   : > { %p339_p1 = scmp.lt.s32.totalorder %s1925_s19, 3 }
   0x5   : > { %p340_p2 = pnand %p1744_p0, %p339_p1 }
   0x7   : > { %343 = sbr.rel (%p340_p2) target bundleno = 806 (0x326), region = 64 }
   0xc   : > { %s379_s21 = smul.u32 19, %s1740_s20  ;;  %v414_v0 = vlaneseq  ;;  %v1887_v1 = vld [vmem:[%s3153_s4 + $0x8] sm:$0xff]   ;;  %v1888_v3 = vld [vmem:[%s3153_s4] sm:$0xff]   ;;  %vm437_vm0 = vcmask 261120   ;;  %s1643_s13 = sld [smem:[#allocation2]]  ;;  %vm1664_vm1 = vcmask 7168  }
   0xd   : > { %v2009_v4 = vld [vmem:[%s3150_s1] sm:$0xf]  ;;  %1803 = vmatprep.subr.bf16.mxu0 %v1887_v1 }
   0xe   : > { %p380_p3 = scmp.lt.s32.totalorder %s379_s21, 37  ;;  %v2001_v2 = vshrl.u32 %v414_v0, 7  ;;  %1804 = vmatpush3.bf16.msra.mxu0 %v1887_v1 }
   0xf   : > { %1805 = vmatprep.subr.bf16.mxu0 %v1888_v3 }
  0x10   : > { %s3196_s21 = smov (!%p380_p3, %s379_s21), 37  ;;  %v2014_v5 = vsub.s32 0, %v2001_v2 }
  0x11   : > { %s1745_s27 = sshll.u32 %s3196_s21, 3 }
  0x12   : > { %v2019_v6 = vrot.slane %v2009_v4, %v2014_v5  ;;  %s2026_s30 = scalar_lea.vmem %s3149_s0, %s1745_s27  ;;  %1806 = vmatpush3.bf16.msra.mxu0 %v1888_v3  ;;  %s3085_s16 = scalar_lea.vmem %s3160_s11, %s1745_s27 }
  0x13   : > { %v2029_v7 = vld [vmem:[%s2026_s30] sm:$0xff]  ;;  %v2032_v8 = vld [vmem:[%s2026_s30 + $0x10] sm:$0xff]  ;;  %v2035_v9 = vld [vmem:[%s2026_s30 + $0x8] sm:$0xff] }
  0x14   : > { %v418_v10 = vmul.f32 %v2019_v6, %v2029_v7  ;;  %v420_v11 = vmul.f32 %v2019_v6, %v2032_v8  ;;  %v419_v12 = vmul.f32 %v2019_v6, %v2035_v9  ;;  %v2044_v13 = vld [vmem:[%s2026_s30 + $0x18] sm:$0xff]  ;;  %v1071_v14 = vpack.c.bf16 %v2035_v9, %v2029_v7  ;;  %v2051_v16 = vld [vmem:[%s2026_s30 + $0x20] sm:$0xff]  ;;  %v2054_v17 = vld [vmem:[%s2026_s30 + $0x28] sm:$0xff] }
  0x15   : > { %v421_v15 = vmul.f32 %v2019_v6, %v2044_v13  ;;  %v1072_v18 = vpack.c.bf16 %v2044_v13, %v2032_v8  ;;  %v422_v23 = vmul.f32 %v2019_v6, %v2051_v16  ;;  %v423_v24 = vmul.f32 %v2019_v6, %v2054_v17  ;;  %v2068_v25 = vld [vmem:[%s2026_s30 + $0x30] sm:$0xff]  ;;  %v2072_v26 = vld [vmem:[%s2026_s30 + $0x38] sm:$0xff]  ;;  %v2081_v31 = vld [vmem:[%s2026_s30 + $0x40] sm:$0xff] }
  0x16   : > { %v438_v19 = vsel %vm437_vm0, %v418_v10, 0.0  ;;  %v444_v20 = vsel %vm437_vm0, %v420_v11, 0.0  ;;  %1807 = vmatprep.mubr.msk.bf16.mxu0 %vm437_vm0, %v1071_v14  ;;  %v441_v21 = vsel %vm437_vm0, %v419_v12, 0.0  ;;  %v424_v29 = vmul.f32 %v2019_v6, %v2068_v25  ;;  %v2084_v32 = vld [vmem:[%s2026_s30 + $0x48] sm:$0xff]  ;;  %v2093_v37 = vld [vmem:[%s2026_s30 + $0x50] sm:$0xff]  ;;  %v2096_v38 = vld [vmem:[%s2026_s30 + $0x58] sm:$0xff] }
  0x17   : > { %439 = vadd.xlane.f32.xlu0 %v438_v19  ;;  %445 = vadd.xlane.f32.xlu1 %v444_v20  ;;  %v447_v22 = vsel %vm437_vm0, %v421_v15, 0.0  ;;  %v450_v27 = vsel %vm437_vm0, %v422_v23, 0.0  ;;  %v453_v28 = vsel %vm437_vm0, %v423_v24, 0.0  ;;  %v425_v30 = vmul.f32 %v2019_v6, %v2072_v26  ;;  %v2107_v44 = vld [vmem:[%s2026_s30 + $0x60] sm:$0xff]  ;;  %v2110_v45 = vld [vmem:[%s2026_s30 + $0x68] sm:$0xff]  ;;  %v2123_v51 = vld [vmem:[%s2026_s30 + $0x70] sm:$0xff] }
  0x18   : > { %1808 = vmatmul.mubr.msk.bf16.vlgmr.msra.gmra.mxu0 %vm437_vm0, %v1072_v18  ;;  %v456_v33 = vsel %vm437_vm0, %v424_v29, 0.0  ;;  %v426_v35 = vmul.f32 %v2019_v6, %v2081_v31  ;;  %v427_v36 = vmul.f32 %v2019_v6, %v2084_v32  ;;  %v428_v39 = vmul.f32 %v2019_v6, %v2093_v37  ;;  %v2126_v52 = vld [vmem:[%s2026_s30 + $0x78] sm:$0xff]  ;;  %v2135_v57 = vld [vmem:[%s2026_s30 + $0x80] sm:$0xff]  ;;  %v2138_v58 = vld [vmem:[%s2026_s30 + $0x88] sm:$0xff] }
  0x19   : > { %v459_v34 = vsel %vm437_vm0, %v425_v30, 0.0  ;;  %v429_v42 = vmul.f32 %v2019_v6, %v2096_v38  ;;  %v1073_v43 = vpack.c.bf16 %v2054_v17, %v2051_v16  ;;  %v1074_v46 = vpack.c.bf16 %v2072_v26, %v2068_v25  ;;  %v2152_v1 = vld [vmem:[%s2026_s30 + $0x90] sm:$0xff]  ;;  %v2175_v19 = vld [vmem:[%s3151_s2] sm:$0xf] }
  0x1a   : > { %v462_v40 = vsel %vm437_vm0, %v426_v35, 0.0  ;;  %v465_v41 = vsel %vm437_vm0, %v427_v36, 0.0  ;;  %v468_v47 = vsel %vm437_vm0, %v428_v39, 0.0  ;;  %v430_v49 = vmul.f32 %v2019_v6, %v2107_v44 }
  0x1b   : > { %442 = vadd.xlane.f32.xlu0 %v441_v21  ;;  %448 = vadd.xlane.f32.xlu1 %v447_v22  ;;  %v471_v48 = vsel %vm437_vm0, %v429_v42, 0.0  ;;  %v431_v50 = vmul.f32 %v2019_v6, %v2110_v45  ;;  %v432_v55 = vmul.f32 %v2019_v6, %v2123_v51  ;;  %v433_v56 = vmul.f32 %v2019_v6, %v2126_v52  ;;  %v2180_v22 = vld [vmem:[%s3152_s3] sm:$0xf] }
  0x1c   : > { %1811 = vmatprep.mubr.msk.bf16.mxu0 %vm437_vm0, %v1073_v43  ;;  %v474_v53 = vsel %vm437_vm0, %v430_v49, 0.0  ;;  %v1075_v59 = vpack.c.bf16 %v2084_v32, %v2081_v31  ;;  %v1076_v60 = vpack.c.bf16 %v2096_v38, %v2093_v37  ;;  %v434_v63 = vmul.f32 %v2019_v6, %v2135_v57 }
  0x1d   : > { %v477_v54 = vsel %vm437_vm0, %v431_v50, 0.0  ;;  %v480_v61 = vsel %vm437_vm0, %v432_v55, 0.0  ;;  %v483_v62 = vsel %vm437_vm0, %v433_v56, 0.0  ;;  %v435_v0 = vmul.f32 %v2019_v6, %v2138_v58 }
  0x1e   : > { %v486_v3 = vsel %vm437_vm0, %v434_v63, 0.0  ;;  %v436_v11 = vmul.f32 %v2019_v6, %v2152_v1  ;;  %v1077_v12 = vpack.c.bf16 %v2110_v45, %v2107_v44  ;;  %v1078_v14 = vpack.c.bf16 %v2126_v52, %v2123_v51 }
  0x1f   : > { %451 = vadd.xlane.f32.xlu0 %v450_v27  ;;  %454 = vadd.xlane.f32.xlu1 %v453_v28  ;;  %v489_v10 = vsel %vm437_vm0, %v435_v0, 0.0  ;;  %v1079_v18 = vpack.c.bf16 %v2138_v58, %v2135_v57  ;;  %v1080_v6 = vpack.c.bf16 %v2152_v1, %v2152_v1  ;;  %v2184_v23 = vrot.slane %v2175_v19, %v2014_v5 }
  0x20   : > { %1812 = vmatmul.mubr.msk.bf16.gmra.mxu0 %vm437_vm0, %v1074_v46  ;;  %v492_v15 = vsel %vm437_vm0, %v436_v11, 0.0  ;;  %v2189_v28 = vsub.s32 1, %v2001_v2 }
  0x21   : > { %1815 = vmatprep.mubr.msk.bf16.mxu0 %vm437_vm0, %v1075_v59 }
  0x22   : > { %v2203_v42 = vrot.slane %v2009_v4, %v2189_v28 }
  0x23   : > { %457 = vadd.xlane.f32.xlu0 %v456_v33  ;;  %460 = vadd.xlane.f32.xlu1 %v459_v34  ;;  %v2195_v33 = vrot.slane %v2180_v22, %v2014_v5 }
  0x27   : > { %463 = vadd.xlane.f32.xlu0 %v462_v40  ;;  %466 = vadd.xlane.f32.xlu1 %v465_v41 }
  0x28   : > { %1816 = vmatmul.mubr.msk.bf16.gmra.mxu0 %vm437_vm0, %v1076_v60 }
  0x29   : > { %1819 = vmatprep.mubr.msk.bf16.mxu0 %vm437_vm0, %v1077_v12 }
  0x2b   : > { %469 = vadd.xlane.f32.xlu0 %v468_v47  ;;  %472 = vadd.xlane.f32.xlu1 %v471_v48 }
  0x2f   : > { %475 = vadd.xlane.f32.xlu0 %v474_v53  ;;  %478 = vadd.xlane.f32.xlu1 %v477_v54 }
  0x30   : > { %1820 = vmatmul.mubr.msk.bf16.gmra.mxu0 %vm437_vm0, %v1078_v14 }
  0x31   : > { %1823 = vmatprep.mubr.msk.bf16.mxu0 %vm437_vm0, %v1079_v18 }
  0x33   : > { %481 = vadd.xlane.f32.xlu0 %v480_v61  ;;  %484 = vadd.xlane.f32.xlu1 %v483_v62 }
  0x37   : > { %487 = vadd.xlane.f32.xlu0 %v486_v3  ;;  %490 = vadd.xlane.f32.xlu1 %v489_v10 }
  0x38   : > { %1824 = vmatmul.mubr.msk.bf16.gmra.mxu0 %vm437_vm0, %v1080_v6 }
  0x3b   : > { %493 = vadd.xlane.f32.xlu0 %v492_v15 }
  0xa0   : > { %v440_v20 = vpop.xlane.xlu0 %439  ;;  %v446_v21 = vpop.xlane.xlu1 %445 }
  0xa1   : > { %v495_v24 = vmul.f32 %v440_v20, %v2029_v7  ;;  %v497_v27 = vmul.f32 %v446_v21, %v2032_v8 }
  0xa3   : > { %v514_v29 = vadd.f32 %v495_v24, %v2029_v7  ;;  %v516_v30 = vadd.f32 %v497_v27, %v2032_v8 }
  0xa4   : > { %v443_v34 = vpop.xlane.xlu0 %442  ;;  %v449_v35 = vpop.xlane.xlu1 %448 }
  0xa5   : > { %v537_v36 = vmul.f32 %v2184_v23, %v514_v29  ;;  %v539_v39 = vmul.f32 %v2184_v23, %v516_v30  ;;  %v496_v40 = vmul.f32 %v443_v34, %v2035_v9  ;;  %v498_v41 = vmul.f32 %v449_v35, %v2044_v13 }
  0xa7   : > { %v515_v43 = vadd.f32 %v496_v40, %v2035_v9  ;;  %v517_v46 = vadd.f32 %v498_v41, %v2044_v13  ;;  %v2208_v5 = vadd.f32 %v2195_v33, %v537_v36  ;;  %v2211_v47 = vadd.f32 %v2195_v33, %v539_v39 }
  0xa8   : > { %v452_v48 = vpop.xlane.xlu0 %451  ;;  %v455_v49 = vpop.xlane.xlu1 %454 }
  0xa9   : > { %v538_v50 = vmul.f32 %v2184_v23, %v515_v43  ;;  %v540_v53 = vmul.f32 %v2184_v23, %v517_v46  ;;  %v499_v54 = vmul.f32 %v452_v48, %v2051_v16  ;;  %v500_v55 = vmul.f32 %v455_v49, %v2054_v17 }
  0xaa   : > { %v583_v56 = vmul.f32 %v2203_v42, %v2208_v5  ;;  %v585_v59 = vmul.f32 %v2203_v42, %v2211_v47 }
  0xab   : > { %v518_v60 = vadd.f32 %v499_v54, %v2051_v16  ;;  %v519_v61 = vadd.f32 %v500_v55, %v2054_v17  ;;  %v2224_v62 = vadd.f32 %v2195_v33, %v538_v50  ;;  %v2227_v63 = vadd.f32 %v2195_v33, %v540_v53 }
  0xac   : > { %v602_v0 = vsel %vm437_vm0, %v583_v56, 0.0  ;;  %v458_v3 = vpop.xlane.xlu0 %457  ;;  %v461_v10 = vpop.xlane.xlu1 %460  ;;  %v608_v18 = vsel %vm437_vm0, %v585_v59, 0.0 }
  0xad   : > { %v541_v11 = vmul.f32 %v2184_v23, %v518_v60  ;;  %v542_v12 = vmul.f32 %v2184_v23, %v519_v61  ;;  %603 = vadd.xlane.f32.xlu1 %v602_v0  ;;  %v501_v14 = vmul.f32 %v458_v3, %v2068_v25  ;;  %v502_v15 = vmul.f32 %v461_v10, %v2072_v26 }
  0xae   : > { %v584_v6 = vmul.f32 %v2203_v42, %v2224_v62  ;;  %v586_v20 = vmul.f32 %v2203_v42, %v2227_v63 }
  0xaf   : > { %v520_v21 = vadd.f32 %v501_v14, %v2068_v25  ;;  %v521_v24 = vadd.f32 %v502_v15, %v2072_v26  ;;  %v2242_v27 = vadd.f32 %v2195_v33, %v541_v11  ;;  %v2245_v29 = vadd.f32 %v2195_v33, %v542_v12 }
  0xb0   : > { %v605_v30 = vsel %vm437_vm0, %v584_v6, 0.0  ;;  %v464_v34 = vpop.xlane.xlu0 %463  ;;  %v467_v35 = vpop.xlane.xlu1 %466  ;;  %v611_v43 = vsel %vm437_vm0, %v586_v20, 0.0 }
  0xb1   : > { %v543_v36 = vmul.f32 %v2184_v23, %v520_v21  ;;  %v544_v39 = vmul.f32 %v2184_v23, %v521_v24  ;;  %609 = vadd.xlane.f32.xlu1 %v608_v18  ;;  %606 = vadd.xlane.f32.xlu0 %v605_v30  ;;  %v503_v40 = vmul.f32 %v464_v34, %v2081_v31 }
  0xb2   : > { %v504_v41 = vmul.f32 %v467_v35, %v2084_v32  ;;  %v587_v46 = vmul.f32 %v2203_v42, %v2242_v27  ;;  %v588_v48 = vmul.f32 %v2203_v42, %v2245_v29 }
  0xb3   : > { %v522_v49 = vadd.f32 %v503_v40, %v2081_v31  ;;  %v2259_v50 = vadd.f32 %v2195_v33, %v543_v36  ;;  %v2262_v53 = vadd.f32 %v2195_v33, %v544_v39 }
  0xb4   : > { %v523_v54 = vadd.f32 %v504_v41, %v2084_v32  ;;  %v614_v55 = vsel %vm437_vm0, %v587_v46, 0.0  ;;  %v470_v56 = vpop.xlane.xlu0 %469  ;;  %v473_v59 = vpop.xlane.xlu1 %472  ;;  %v617_v10 = vsel %vm437_vm0, %v588_v48, 0.0 }
  0xb5   : > { %v545_v60 = vmul.f32 %v2184_v23, %v522_v49  ;;  %612 = vadd.xlane.f32.xlu0 %v611_v43  ;;  %615 = vadd.xlane.f32.xlu1 %v614_v55  ;;  %v505_v61 = vmul.f32 %v470_v56, %v2093_v37  ;;  %v506_v0 = vmul.f32 %v473_v59, %v2096_v38 }
  0xb6   : > { %v546_v3 = vmul.f32 %v2184_v23, %v523_v54  ;;  %v589_v11 = vmul.f32 %v2203_v42, %v2259_v50  ;;  %v590_v12 = vmul.f32 %v2203_v42, %v2262_v53 }
  0xb7   : > { %v524_v14 = vadd.f32 %v505_v61, %v2093_v37  ;;  %v525_v15 = vadd.f32 %v506_v0, %v2096_v38  ;;  %v2278_v18 = vadd.f32 %v2195_v33, %v545_v60 }
  0xb8   : > { %v620_v6 = vsel %vm437_vm0, %v589_v11, 0.0  ;;  %v476_v20 = vpop.xlane.xlu0 %475  ;;  %v479_v21 = vpop.xlane.xlu1 %478  ;;  %v2282_v24 = vadd.f32 %v2195_v33, %v546_v3  ;;  %v623_v39 = vsel %vm437_vm0, %v590_v12, 0.0 }
  0xb9   : > { %v547_v30 = vmul.f32 %v2184_v23, %v524_v14  ;;  %v548_v34 = vmul.f32 %v2184_v23, %v525_v15  ;;  %618 = vadd.xlane.f32.xlu0 %v617_v10  ;;  %621 = vadd.xlane.f32.xlu1 %v620_v6  ;;  %v507_v35 = vmul.f32 %v476_v20, %v2107_v44 }
  0xba   : > { %v508_v36 = vmul.f32 %v479_v21, %v2110_v45  ;;  %v591_v40 = vmul.f32 %v2203_v42, %v2278_v18  ;;  %v592_v41 = vmul.f32 %v2203_v42, %v2282_v24 }
  0xbb   : > { %v526_v43 = vadd.f32 %v507_v35, %v2107_v44  ;;  %v2295_v46 = vadd.f32 %v2195_v33, %v547_v30  ;;  %v2298_v48 = vadd.f32 %v2195_v33, %v548_v34 }
  0xbc   : > { %v527_v49 = vadd.f32 %v508_v36, %v2110_v45  ;;  %v626_v54 = vsel %vm437_vm0, %v591_v40, 0.0  ;;  %v482_v55 = vpop.xlane.xlu0 %481  ;;  %v485_v56 = vpop.xlane.xlu1 %484  ;;  %v629_v3 = vsel %vm437_vm0, %v592_v41, 0.0 }
  0xbd   : > { %v549_v59 = vmul.f32 %v2184_v23, %v526_v43  ;;  %624 = vadd.xlane.f32.xlu0 %v623_v39  ;;  %627 = vadd.xlane.f32.xlu1 %v626_v54  ;;  %v509_v60 = vmul.f32 %v482_v55, %v2123_v51  ;;  %v510_v61 = vmul.f32 %v485_v56, %v2126_v52 }
  0xbe   : > { %v550_v0 = vmul.f32 %v2184_v23, %v527_v49  ;;  %v593_v10 = vmul.f32 %v2203_v42, %v2295_v46  ;;  %v594_v11 = vmul.f32 %v2203_v42, %v2298_v48 }
  0xbf   : > { %v528_v12 = vadd.f32 %v509_v60, %v2123_v51  ;;  %v529_v14 = vadd.f32 %v510_v61, %v2126_v52  ;;  %v2314_v15 = vadd.f32 %v2195_v33, %v549_v59 }
  0xc0   : > { %v632_v6 = vsel %vm437_vm0, %v593_v10, 0.0  ;;  %v488_v20 = vpop.xlane.xlu0 %487  ;;  %v491_v21 = vpop.xlane.xlu1 %490  ;;  %v2318_v30 = vadd.f32 %v2195_v33, %v550_v0  ;;  %v635_v40 = vsel %vm437_vm0, %v594_v11, 0.0 }
  0xc1   : > { %v551_v34 = vmul.f32 %v2184_v23, %v528_v12  ;;  %v552_v35 = vmul.f32 %v2184_v23, %v529_v14  ;;  %630 = vadd.xlane.f32.xlu0 %v629_v3  ;;  %633 = vadd.xlane.f32.xlu1 %v632_v6  ;;  %v511_v36 = vmul.f32 %v488_v20, %v2135_v57 }
  0xc2   : > { %v512_v39 = vmul.f32 %v491_v21, %v2138_v58  ;;  %v595_v41 = vmul.f32 %v2203_v42, %v2314_v15  ;;  %v596_v43 = vmul.f32 %v2203_v42, %v2318_v30 }
  0xc3   : > { %v530_v49 = vadd.f32 %v511_v36, %v2135_v57  ;;  %v2331_v54 = vadd.f32 %v2195_v33, %v551_v34  ;;  %v2334_v55 = vadd.f32 %v2195_v33, %v552_v35 }
  0xc4   : > { %v531_v56 = vadd.f32 %v512_v39, %v2138_v58  ;;  %v638_v59 = vsel %vm437_vm0, %v595_v41, 0.0  ;;  %v494_v60 = vpop.xlane.xlu0 %493  ;;  %v641_v11 = vsel %vm437_vm0, %v596_v43, 0.0  ;;  %v1889_v43 = vld [vmem:[%s3155_s6 + $0x38] sm:$0xff]  }
  0xc5   : > { %v553_v61 = vmul.f32 %v2184_v23, %v530_v49  ;;  %636 = vadd.xlane.f32.xlu0 %v635_v40  ;;  %639 = vadd.xlane.f32.xlu1 %v638_v59  ;;  %v513_v0 = vmul.f32 %v494_v60, %v2152_v1  ;;  %v597_v3 = vmul.f32 %v2203_v42, %v2331_v54  ;;  %v1892_v59 = vld [vmem:[%s3155_s6 + $0x20] sm:$0xff]   ;;  %v1893_v60 = vld [vmem:[%s3155_s6 + $0x18] sm:$0xff]  }
  0xc6   : > { %v554_v10 = vmul.f32 %v2184_v23, %v531_v56  ;;  %v598_v12 = vmul.f32 %v2203_v42, %v2334_v55  ;;  %1827 = vmatprep.subr.bf16.mxu0 %v1889_v43  ;;  %1863 = vmatprep.subr.bf16.mxu1 %v1889_v43 }
  0xc7   : > { %v532_v14 = vadd.f32 %v513_v0, %v2152_v1  ;;  %v644_v6 = vsel %vm437_vm0, %v597_v3, 0.0  ;;  %v2349_v20 = vadd.f32 %v2195_v33, %v553_v61  ;;  %1828 = vmatpush3.bf16.msra.mxu0 %v1889_v43  ;;  %1871 = vmatpush3.bf16.msra.mxu1 %v1889_v43  ;;  %v2386_v0 = vld [vmem:[%s3154_s5] ss:$0 sm:$0xff]  ;;  %v1894_v3 = vld [vmem:[%s3155_s6 + $0x10] sm:$0xff]  }
  0xc8   : > { %v2352_v21 = vadd.f32 %v2195_v33, %v554_v10  ;;  %v647_v36 = vsel %vm437_vm0, %v598_v12, 0.0  ;;  %v1896_v43 = vld [vmem:[%s3155_s6] sm:$0xff]  }
  0xc9   : > { %v555_v34 = vmul.f32 %v2184_v23, %v532_v14  ;;  %642 = vadd.xlane.f32.xlu0 %v641_v11  ;;  %645 = vadd.xlane.f32.xlu1 %v644_v6  ;;  %v599_v35 = vmul.f32 %v2203_v42, %v2349_v20  ;;  %v1895_v6 = vld [vmem:[%s3155_s6 + $0x8] sm:$0xff]  }
  0xca   : > { %v600_v39 = vmul.f32 %v2203_v42, %v2352_v21 }
  0xcb   : > { %v650_v40 = vsel %vm437_vm0, %v599_v35, 0.0  ;;  %v2362_v41 = vadd.f32 %v2195_v33, %v555_v34  ;;  %v1890_v33 = vld [vmem:[%s3155_s6 + $0x30] sm:$0xff]  }
  0xcc   : > { %v653_v49 = vsel %vm437_vm0, %v600_v39, 0.0  ;;  %1829 = vmatprep.subr.bf16.mxu0 %v1890_v33  ;;  %1864 = vmatprep.subr.bf16.mxu1 %v1890_v33 }
  0xcd   : > { %648 = vadd.xlane.f32.xlu0 %v647_v36  ;;  %651 = vadd.xlane.f32.xlu1 %v650_v40  ;;  %v601_v23 = vmul.f32 %v2203_v42, %v2362_v41  ;;  %v1891_v42 = vld [vmem:[%s3155_s6 + $0x28] sm:$0xff]  }
  0xce   : > { %1830 = vmatpush3.bf16.msra.mxu0 %v1890_v33  ;;  %1872 = vmatpush3.bf16.msra.mxu1 %v1890_v33 }
  0xcf   : > { %v656_v56 = vsel %vm437_vm0, %v601_v23, 0.0  ;;  %1831 = vmatprep.subr.bf16.mxu0 %v1891_v42  ;;  %1865 = vmatprep.subr.bf16.mxu1 %v1891_v42 }
  0xd1   : > { %654 = vadd.xlane.f32.xlu0 %v653_v49  ;;  %657 = vadd.xlane.f32.xlu1 %v656_v56 }
  0xd2   : > { %1832 = vmatpush3.bf16.msra.mxu0 %v1891_v42  ;;  %1873 = vmatpush3.bf16.msra.mxu1 %v1891_v42 }
  0xd3   : > { %1833 = vmatprep.subr.bf16.mxu0 %v1892_v59  ;;  %1866 = vmatprep.subr.bf16.mxu1 %v1892_v59 }
  0xd6   : > { %1834 = vmatpush3.bf16.msra.mxu0 %v1892_v59  ;;  %1874 = vmatpush3.bf16.msra.mxu1 %v1892_v59 }
  0xd7   : > { %1835 = vmatprep.subr.bf16.mxu0 %v1893_v60  ;;  %1867 = vmatprep.subr.bf16.mxu1 %v1893_v60 }
  0xd8   : > { %v1809_v61 = vpop.f32.mrf.mxu0 }
  0xd9   : > { %v1177_v12 = vadd.f32 %v1809_v61, %v2386_v0 }
  0xda   : > { %1836 = vmatpush3.bf16.msra.mxu0 %v1893_v60  ;;  %1875 = vmatpush3.bf16.msra.mxu1 %v1893_v60  ;;  %v1168_v10 = vpop.f32.mrf.mxu0 }
  0xdb   : > { %1837 = vmatprep.subr.bf16.mxu0 %v1894_v3  ;;  %1868 = vmatprep.subr.bf16.mxu1 %v1894_v3  ;;  %v1169_v11 = vadd.f32 %v2386_v0, %v1168_v10  ;;  %v1248_v40 = vmax.f32 %v1177_v12, 0.0 }
  0xdc   : > { %v1810_v14 = vpop.f32.mrf.mxu0 }
  0xdd   : > { %v1180_v34 = vadd.f32 %v1810_v14, %v2386_v0  ;;  %v1246_v36 = vmax.f32 %v1169_v11, 0.0 }
  0xde   : > { %1838 = vmatpush3.bf16.msra.mxu0 %v1894_v3  ;;  %1876 = vmatpush3.bf16.msra.mxu1 %v1894_v3  ;;  %v1171_v35 = vpop.f32.mrf.mxu0 }
  0xdf   : > { %1839 = vmatprep.subr.bf16.mxu0 %v1895_v6  ;;  %1869 = vmatprep.subr.bf16.mxu1 %v1895_v6  ;;  %v1172_v39 = vadd.f32 %v2386_v0, %v1171_v35  ;;  %v1249_v23 = vmax.f32 %v1180_v34, 0.0 }
  0xe0   : > { %v1813_v56 = vpop.f32.mrf.mxu0 }
  0xe1   : > { %v1247_v49 = vmax.f32 %v1172_v39, 0.0  ;;  %v1193_v42 = vadd.f32 %v1813_v56, %v2386_v0  ;;  %v1266_v60 = vpack.c.bf16 %v1249_v23, %v1248_v40 }
  0xe2   : > { %1840 = vmatpush3.bf16.msra.mxu0 %v1895_v6  ;;  %1877 = vmatpush3.bf16.msra.mxu1 %v1895_v6  ;;  %v1184_v59 = vpop.f32.mrf.mxu0 }
  0xe3   : > { %1841 = vmatprep.subr.bf16.mxu0 %v1896_v43  ;;  %1870 = vmatprep.subr.bf16.mxu1 %v1896_v43  ;;  %v1265_v33 = vpack.c.bf16 %v1247_v49, %v1246_v36  ;;  %v1185_v61 = vadd.f32 %v2386_v0, %v1184_v59  ;;  %v1252_v11 = vmax.f32 %v1193_v42, 0.0 }
  0xe4   : > { %v1814_v3 = vpop.f32.mrf.mxu0 }
  0xe5   : > { %1843 = vmatprep.mubr.bf16.mxu0 %v1265_v33  ;;  %v1196_v10 = vadd.f32 %v1814_v3, %v2386_v0  ;;  %v1250_v14 = vmax.f32 %v1185_v61, 0.0 }
  0xe6   : > { %1842 = vmatpush3.bf16.msra.mxu0 %v1896_v43  ;;  %1878 = vmatpush3.bf16.msra.mxu1 %v1896_v43  ;;  %v1187_v12 = vpop.f32.mrf.mxu0 }
  0xe7   : > { %v1253_v34 = vmax.f32 %v1196_v10, 0.0  ;;  %v1188_v6 = vadd.f32 %v2386_v0, %v1187_v12 }
  0xe8   : > { %v1817_v36 = vpop.f32.mrf.mxu0 }
  0xe9   : > { %1844 = vmatmul.mubr.bf16.vlgmr.msra.gmra.mxu0 %v1266_v60  ;;  %v1251_v35 = vmax.f32 %v1188_v6, 0.0  ;;  %v1268_v39 = vpack.c.bf16 %v1253_v34, %v1252_v11  ;;  %v1209_v40 = vadd.f32 %v1817_v36, %v2386_v0 }
  0xea   : > { %v1200_v23 = vpop.f32.mrf.mxu0 }
  0xeb   : > { %v1267_v49 = vpack.c.bf16 %v1251_v35, %v1250_v14  ;;  %v1201_v56 = vadd.f32 %v2386_v0, %v1200_v23  ;;  %v1256_v42 = vmax.f32 %v1209_v40, 0.0 }
  0xec   : > { %v1818_v33 = vpop.f32.mrf.mxu0 }
  0xed   : > { %1847 = vmatprep.mubr.bf16.mxu1 %v1267_v49  ;;  %v1212_v43 = vadd.f32 %v1818_v33, %v2386_v0  ;;  %v1254_v61 = vmax.f32 %v1201_v56, 0.0 }
  0xee   : > { %1848 = vmatmul.mubr.bf16.vlgmr.msra.gmra.mxu1 %v1268_v39  ;;  %v1203_v59 = vpop.f32.mrf.mxu0 }
  0xef   : > { %v1257_v3 = vmax.f32 %v1212_v43, 0.0  ;;  %v1204_v60 = vadd.f32 %v2386_v0, %v1203_v59 }
  0xf0   : > { %v1821_v10 = vpop.f32.mrf.mxu0 }
  0xf1   : > { %v1255_v12 = vmax.f32 %v1204_v60, 0.0  ;;  %v1270_v11 = vpack.c.bf16 %v1257_v3, %v1256_v42  ;;  %v1225_v34 = vadd.f32 %v1821_v10, %v2386_v0 }
  0xf2   : > { %v1216_v6 = vpop.f32.mrf.mxu0 }
  0xf3   : > { %v1269_v14 = vpack.c.bf16 %v1255_v12, %v1254_v61  ;;  %v1217_v35 = vadd.f32 %v2386_v0, %v1216_v6  ;;  %v1260_v39 = vmax.f32 %v1225_v34, 0.0 }
  0xf4   : > { %v1822_v36 = vpop.f32.mrf.mxu0 }
  0xf5   : > { %v1228_v23 = vadd.f32 %v1822_v36, %v2386_v0  ;;  %1851 = vmatprep.mubr.bf16.mxu1 %v1269_v14  ;;  %v1258_v49 = vmax.f32 %v1217_v35, 0.0 }
  0xf6   : > { %v1219_v40 = vpop.f32.mrf.mxu0  ;;  %1852 = vmatmul.mubr.bf16.gmra.mxu1 %v1270_v11 }
  0xf7   : > { %v1261_v56 = vmax.f32 %v1228_v23, 0.0  ;;  %v1220_v33 = vadd.f32 %v2386_v0, %v1219_v40  ;;  %v2418_v40 = vrot.slane %v2175_v19, %v2189_v28 }
  0xf8   : > { %v1825_v3 = vpop.f32.mrf.mxu0 }
  0xf9   : > { %v1259_v43 = vmax.f32 %v1220_v33, 0.0  ;;  %v1272_v59 = vpack.c.bf16 %v1261_v56, %v1260_v39  ;;  %v1241_v61 = vadd.f32 %v1825_v3, %v2386_v0  ;;  %v2422_v56 = vsub.s32 2, %v2001_v2 }
  0xfa   : > { %v1232_v60 = vpop.f32.mrf.mxu0 }
  0xfb   : > { %v1271_v42 = vpack.c.bf16 %v1259_v43, %v1258_v49  ;;  %v1233_v10 = vadd.f32 %v2386_v0, %v1232_v60  ;;  %v1264_v6 = vmax.f32 %v1241_v61, 0.0 }
  0xfc   : > { %v1826_v12 = vpop.f32.mrf.mxu0 }
  0xfd   : > { %1855 = vmatprep.mubr.bf16.mxu1 %v1271_v42  ;;  %v1262_v14 = vmax.f32 %v1233_v10, 0.0  ;;  %v1274_v36 = vpack.c.bf16 %v1264_v6, %v1264_v6 }
  0xfe   : > { %1856 = vmatmul.mubr.bf16.gmra.mxu1 %v1272_v59  ;;  %v1235_v34 = vpop.f32.mrf.mxu0 }
  0xff   : > { %v1236_v11 = vadd.f32 %v2386_v0, %v1235_v34  ;;  %v2427_v0 = vrot.slane %v2180_v22, %v2189_v28 }
 0x101   : > { %v1263_v35 = vmax.f32 %v1236_v11, 0.0 }
 0x103   : > { %v1273_v23 = vpack.c.bf16 %v1263_v35, %v1262_v14 }
 0x105   : > { %1859 = vmatprep.mubr.bf16.mxu1 %v1273_v23 }
 0x106   : > { %1860 = vmatmul.mubr.bf16.gmra.mxu1 %v1274_v36 }
 0x136   : > { %v604_v39 = vpop.xlane.xlu1 %603 }
 0x137   : > { %v659_v49 = vmul.f32 %v604_v39, %v2029_v7  ;;  %v2434_v7 = vrot.slane %v2009_v4, %v2422_v56 }
 0x139   : > { %v678_v33 = vadd.f32 %v659_v49, %v2208_v5 }
 0x13a   : > { %v610_v43 = vpop.xlane.xlu1 %609  ;;  %v607_v59 = vpop.xlane.xlu0 %606 }
 0x13b   : > { %v701_v42 = vmul.f32 %v2418_v40, %v678_v33  ;;  %v661_v3 = vmul.f32 %v610_v43, %v2032_v8  ;;  %v660_v61 = vmul.f32 %v607_v59, %v2035_v9 }
 0x13d   : > { %v680_v60 = vadd.f32 %v661_v3, %v2211_v47  ;;  %v679_v5 = vadd.f32 %v660_v61, %v2224_v62  ;;  %v2439_v10 = vadd.f32 %v2427_v0, %v701_v42 }
 0x13e   : > { %v616_v28 = vpop.xlane.xlu1 %615  ;;  %v613_v12 = vpop.xlane.xlu0 %612 }
 0x13f   : > { %v703_v6 = vmul.f32 %v2418_v40, %v680_v60  ;;  %v702_v34 = vmul.f32 %v2418_v40, %v679_v5  ;;  %v663_v8 = vmul.f32 %v616_v28, %v2051_v16  ;;  %v662_v9 = vmul.f32 %v613_v12, %v2044_v13 }
 0x140   : > { %v747_v4 = vmul.f32 %v2434_v7, %v2439_v10 }
 0x141   : > { %v682_v47 = vadd.f32 %v663_v8, %v2242_v27  ;;  %v681_v62 = vadd.f32 %v662_v9, %v2227_v63  ;;  %v2450_v14 = vadd.f32 %v2427_v0, %v703_v6  ;;  %v2453_v11 = vadd.f32 %v2427_v0, %v702_v34 }
 0x142   : > { %v766_v35 = vsel %vm437_vm0, %v747_v4, 0.0  ;;  %v622_v36 = vpop.xlane.xlu1 %621  ;;  %v619_v23 = vpop.xlane.xlu0 %618 }
 0x143   : > { %v705_v16 = vmul.f32 %v2418_v40, %v682_v47  ;;  %v704_v13 = vmul.f32 %v2418_v40, %v681_v62  ;;  %767 = vadd.xlane.f32.xlu0 %v766_v35  ;;  %v665_v39 = vmul.f32 %v622_v36, %v2068_v25  ;;  %v664_v27 = vmul.f32 %v619_v23, %v2054_v17 }
 0x144   : > { %v749_v63 = vmul.f32 %v2434_v7, %v2450_v14  ;;  %v748_v49 = vmul.f32 %v2434_v7, %v2453_v11 }
 0x145   : > { %v684_v33 = vadd.f32 %v665_v39, %v2259_v50  ;;  %v683_v43 = vadd.f32 %v664_v27, %v2245_v29  ;;  %v2467_v59 = vadd.f32 %v2427_v0, %v705_v16  ;;  %v2470_v42 = vadd.f32 %v2427_v0, %v704_v13 }
 0x146   : > { %v772_v25 = vsel %vm437_vm0, %v749_v63, 0.0  ;;  %v628_v3 = vpop.xlane.xlu1 %627  ;;  %v769_v17 = vsel %vm437_vm0, %v748_v49, 0.0  ;;  %v625_v61 = vpop.xlane.xlu0 %624 }
 0x147   : > { %v707_v60 = vmul.f32 %v2418_v40, %v684_v33  ;;  %v706_v5 = vmul.f32 %v2418_v40, %v683_v43  ;;  %773 = vadd.xlane.f32.xlu0 %v772_v25  ;;  %v667_v50 = vmul.f32 %v628_v3, %v2081_v31  ;;  %770 = vadd.xlane.f32.xlu1 %v769_v17 }
 0x148   : > { %v666_v29 = vmul.f32 %v625_v61, %v2072_v26  ;;  %v751_v28 = vmul.f32 %v2434_v7, %v2467_v59  ;;  %v750_v12 = vmul.f32 %v2434_v7, %v2470_v42 }
 0x149   : > { %v686_v6 = vadd.f32 %v667_v50, %v2278_v18  ;;  %v2484_v34 = vadd.f32 %v2427_v0, %v707_v60  ;;  %v2487_v8 = vadd.f32 %v2427_v0, %v706_v5 }
 0x14a   : > { %v685_v9 = vadd.f32 %v666_v29, %v2262_v53  ;;  %v778_v31 = vsel %vm437_vm0, %v751_v28, 0.0  ;;  %v634_v4 = vpop.xlane.xlu1 %633  ;;  %v775_v26 = vsel %vm437_vm0, %v750_v12, 0.0  ;;  %v631_v47 = vpop.xlane.xlu0 %630 }
 0x14b   : > { %v709_v62 = vmul.f32 %v2418_v40, %v686_v6  ;;  %779 = vadd.xlane.f32.xlu0 %v778_v31  ;;  %v669_v35 = vmul.f32 %v634_v4, %v2093_v37  ;;  %776 = vadd.xlane.f32.xlu1 %v775_v26  ;;  %v668_v18 = vmul.f32 %v631_v47, %v2084_v32 }
 0x14c   : > { %v708_v36 = vmul.f32 %v2418_v40, %v685_v9  ;;  %v753_v23 = vmul.f32 %v2434_v7, %v2484_v34  ;;  %v752_v53 = vmul.f32 %v2434_v7, %v2487_v8 }
 0x14d   : > { %v688_v16 = vadd.f32 %v669_v35, %v2295_v46  ;;  %v687_v13 = vadd.f32 %v668_v18, %v2282_v24  ;;  %v2503_v39 = vadd.f32 %v2427_v0, %v709_v62 }
 0x14e   : > { %v784_v37 = vsel %vm437_vm0, %v753_v23, 0.0  ;;  %v640_v27 = vpop.xlane.xlu1 %639  ;;  %v781_v32 = vsel %vm437_vm0, %v752_v53, 0.0  ;;  %v637_v63 = vpop.xlane.xlu0 %636  ;;  %v2508_v49 = vadd.f32 %v2427_v0, %v708_v36 }
 0x14f   : > { %v711_v33 = vmul.f32 %v2418_v40, %v688_v16  ;;  %v710_v43 = vmul.f32 %v2418_v40, %v687_v13  ;;  %785 = vadd.xlane.f32.xlu0 %v784_v37  ;;  %v671_v46 = vmul.f32 %v640_v27, %v2107_v44  ;;  %782 = vadd.xlane.f32.xlu1 %v781_v32 }
 0x150   : > { %v670_v24 = vmul.f32 %v637_v63, %v2096_v38  ;;  %v755_v25 = vmul.f32 %v2434_v7, %v2503_v39  ;;  %v754_v3 = vmul.f32 %v2434_v7, %v2508_v49 }
 0x151   : > { %v690_v17 = vadd.f32 %v671_v46, %v2314_v15  ;;  %v2520_v61 = vadd.f32 %v2427_v0, %v711_v33  ;;  %v2523_v60 = vadd.f32 %v2427_v0, %v710_v43 }
 0x152   : > { %v689_v5 = vadd.f32 %v670_v24, %v2298_v48  ;;  %v790_v44 = vsel %vm437_vm0, %v755_v25, 0.0  ;;  %v646_v50 = vpop.xlane.xlu1 %645  ;;  %v787_v38 = vsel %vm437_vm0, %v754_v3, 0.0  ;;  %v643_v29 = vpop.xlane.xlu0 %642 }
 0x153   : > { %v713_v28 = vmul.f32 %v2418_v40, %v690_v17  ;;  %791 = vadd.xlane.f32.xlu0 %v790_v44  ;;  %v673_v12 = vmul.f32 %v646_v50, %v2123_v51  ;;  %788 = vadd.xlane.f32.xlu1 %v787_v38  ;;  %v672_v15 = vmul.f32 %v643_v29, %v2110_v45 }
 0x154   : > { %v712_v6 = vmul.f32 %v2418_v40, %v689_v5  ;;  %v757_v9 = vmul.f32 %v2434_v7, %v2520_v61  ;;  %v756_v48 = vmul.f32 %v2434_v7, %v2523_v60 }
 0x155   : > { %v692_v31 = vadd.f32 %v673_v12, %v2331_v54  ;;  %v691_v4 = vadd.f32 %v672_v15, %v2318_v30  ;;  %v2539_v26 = vadd.f32 %v2427_v0, %v713_v28 }
 0x156   : > { %v796_v51 = vsel %vm437_vm0, %v757_v9, 0.0  ;;  %v652_v47 = vpop.xlane.xlu1 %651  ;;  %v793_v45 = vsel %vm437_vm0, %v756_v48, 0.0  ;;  %v649_v62 = vpop.xlane.xlu0 %648  ;;  %v2544_v35 = vadd.f32 %v2427_v0, %v712_v6 }
 0x157   : > { %v715_v18 = vmul.f32 %v2418_v40, %v692_v31  ;;  %v714_v36 = vmul.f32 %v2418_v40, %v691_v4  ;;  %797 = vadd.xlane.f32.xlu0 %v796_v51  ;;  %v675_v54 = vmul.f32 %v652_v47, %v2135_v57  ;;  %794 = vadd.xlane.f32.xlu1 %v793_v45 }
 0x158   : > { %v674_v30 = vmul.f32 %v649_v62, %v2126_v52  ;;  %v759_v23 = vmul.f32 %v2434_v7, %v2539_v26  ;;  %v758_v53 = vmul.f32 %v2434_v7, %v2544_v35 }
 0x159   : > { %v694_v16 = vadd.f32 %v675_v54, %v2349_v20  ;;  %v2556_v13 = vadd.f32 %v2427_v0, %v715_v18  ;;  %v2559_v37 = vadd.f32 %v2427_v0, %v714_v36  ;;  %v2624_v54 = vrot.slane %v2175_v19, %v2422_v56 }
 0x15a   : > { %v693_v27 = vadd.f32 %v674_v30, %v2334_v55  ;;  %v802_v57 = vsel %vm437_vm0, %v759_v23, 0.0  ;;  %v658_v32 = vpop.xlane.xlu1 %657  ;;  %v799_v52 = vsel %vm437_vm0, %v758_v53, 0.0  ;;  %v655_v63 = vpop.xlane.xlu0 %654  ;;  %v2627_v30 = vld [vmem:[%s2026_s30] sm:$0xff]  ;;  %v2631_v53 = vsub.s32 3, %v2001_v2  ;;  %v2646_v2 = vld [vmem:[%s2026_s30 + $0x10] sm:$0xff] }
 0x15b   : > { %v717_v33 = vmul.f32 %v2418_v40, %v694_v16  ;;  %803 = vadd.xlane.f32.xlu0 %v802_v57  ;;  %v677_v43 = vmul.f32 %v658_v32, %v2152_v1  ;;  %800 = vadd.xlane.f32.xlu1 %v799_v52  ;;  %v676_v20 = vmul.f32 %v655_v63, %v2138_v58  ;;  %v2642_v63 = vld [vmem:[%s2026_s30 + $0x8] sm:$0xff] }
 0x15c   : > { %v716_v46 = vmul.f32 %v2418_v40, %v693_v27  ;;  %v761_v24 = vmul.f32 %v2434_v7, %v2556_v13  ;;  %v760_v55 = vmul.f32 %v2434_v7, %v2559_v37  ;;  %v2636_v27 = vrot.slane %v2180_v22, %v2422_v56  ;;  %v1900_v22 = vld [vmem:[%s3150_s1] sm:$0xf] }
 0x15d   : > { %v696_v25 = vadd.f32 %v677_v43, %v2362_v41  ;;  %v695_v3 = vadd.f32 %v676_v20, %v2352_v21  ;;  %v2575_v17 = vadd.f32 %v2427_v0, %v717_v33  ;;  %v2653_v56 = vrot.slane %v1900_v22, %v2631_v53 }
 0x15e   : > { %v808_v1 = vsel %vm437_vm0, %v761_v24, 0.0  ;;  %v805_v5 = vsel %vm437_vm0, %v760_v55, 0.0  ;;  %v2580_v58 = vadd.f32 %v2427_v0, %v716_v46 }
 0x15f   : > { %v719_v44 = vmul.f32 %v2418_v40, %v696_v25  ;;  %v718_v50 = vmul.f32 %v2418_v40, %v695_v3  ;;  %809 = vadd.xlane.f32.xlu0 %v808_v1  ;;  %806 = vadd.xlane.f32.xlu1 %v805_v5  ;;  %v763_v41 = vmul.f32 %v2434_v7, %v2575_v17  ;;  %v2665_v5 = vld [vmem:[%s2026_s30 + $0x18] sm:$0xff] }
 0x160   : > { %v762_v21 = vmul.f32 %v2434_v7, %v2580_v58 }
 0x161   : > { %v814_v38 = vsel %vm437_vm0, %v763_v41, 0.0  ;;  %v2590_v29 = vadd.f32 %v2427_v0, %v719_v44  ;;  %v2593_v28 = vadd.f32 %v2427_v0, %v718_v50  ;;  %v2669_v50 = vld [vmem:[%s2026_s30 + $0x20] sm:$0xff] }
 0x162   : > { %v811_v12 = vsel %vm437_vm0, %v762_v21, 0.0 }
 0x163   : > { %815 = vadd.xlane.f32.xlu0 %v814_v38  ;;  %812 = vadd.xlane.f32.xlu1 %v811_v12  ;;  %v765_v40 = vmul.f32 %v2434_v7, %v2590_v29  ;;  %v764_v15 = vmul.f32 %v2434_v7, %v2593_v28 }
 0x165   : > { %v820_v6 = vsel %vm437_vm0, %v765_v40, 0.0  ;;  %v817_v9 = vsel %vm437_vm0, %v764_v15, 0.0  ;;  %v2685_v15 = vld [vmem:[%s3156_s7] ss:$0 sm:$0xff] }
 0x167   : > { %821 = vadd.xlane.f32.xlu0 %v820_v6  ;;  %818 = vadd.xlane.f32.xlu1 %v817_v9 }
 0x1ae   : > { %v2602_v48 = vpop.f32.mrf.mxu1 }
 0x1b0   : > { %v2604_v0 = vpop.f32.mrf.mxu1 }
 0x1b2   : > { %v2606_v31 = vpop.f32.mrf.mxu1 }
 0x1b4   : > { %v2608_v4 = vpop.f32.mrf.mxu1 }
 0x1b6   : > { %v2610_v51 = vpop.f32.mrf.mxu1 }
 0x1b8   : > { %v2612_v47 = vpop.f32.mrf.mxu1 }
 0x1ba   : > { %v2614_v7 = vpop.f32.mrf.mxu1 }
 0x1bc   : > { %v2616_v45 = vpop.f32.mrf.mxu1 }
 0x1be   : > { %v2618_v62 = vpop.f32.mrf.mxu1 }
 0x1c0   : > { %v2620_v18 = vpop.f32.mrf.mxu1 }
 0x1c2   : > { %v2638_v57 = vpop.f32.mrf.mxu1 }
 0x1c4   : > { %v2660_v24 = vpop.f32.mrf.mxu1 }
 0x1c6   : > { %v1861_v41 = vpop.f32.mrf.mxu1 }
 0x1cc   : > { %v768_v36 = vpop.xlane.xlu0 %767 }
 0x1cd   : > { %v823_v23 = vmul.f32 %v2627_v30, %v768_v36 }
 0x1cf   : > { %v842_v16 = vadd.f32 %v823_v23, %v2439_v10  ;;  %v1453_v23 = vadd.f32 %v1861_v41, %v2685_v15 }
 0x1d0   : > { %v771_v32 = vpop.xlane.xlu1 %770  ;;  %v774_v52 = vpop.xlane.xlu0 %773 }
 0x1d1   : > { %v865_v19 = vmul.f32 %v2624_v54, %v842_v16  ;;  %v824_v33 = vmul.f32 %v2642_v63, %v771_v32  ;;  %v825_v10 = vmul.f32 %v2646_v2, %v774_v52  ;;  %v2692_v16 = vld [vmem:[%s2026_s30 + $0x28] sm:$0xff]  ;;  %v2696_v52 = vld [vmem:[%s2026_s30 + $0x30] sm:$0xff] }
 0x1d3   : > { %v843_v43 = vadd.f32 %v824_v33, %v2453_v11  ;;  %v844_v20 = vadd.f32 %v825_v10, %v2450_v14  ;;  %v2658_v46 = vadd.f32 %v2636_v27, %v865_v19  ;;  %v2699_v33 = vpop.f32.mrf.mxu1 }
 0x1d4   : > { %v777_v55 = vpop.xlane.xlu1 %776  ;;  %v780_v25 = vpop.xlane.xlu0 %779 }
 0x1d5   : > { %v866_v3 = vmul.f32 %v2624_v54, %v843_v43  ;;  %v867_v1 = vmul.f32 %v2624_v54, %v844_v20  ;;  %v826_v44 = vmul.f32 %v2665_v5, %v777_v55  ;;  %v827_v14 = vmul.f32 %v2669_v50, %v780_v25 }
 0x1d6   : > { %v911_v11 = vmul.f32 %v2653_v56, %v2658_v46  ;;  %v1476_v43 = vmax.f32 %v1453_v23, 0.0  ;;  %v2730_v23 = vld [vmem:[%s2026_s30 + $0x40] sm:$0xff] }
 0x1d7   : > { %v845_v21 = vadd.f32 %v826_v44, %v2470_v42  ;;  %v846_v38 = vadd.f32 %v827_v14, %v2467_v59  ;;  %v2677_v12 = vadd.f32 %v2636_v27, %v866_v3  ;;  %v2680_v40 = vadd.f32 %v2636_v27, %v867_v1  ;;  %v2716_v1 = vld [vmem:[%s3158_s9] ss:$0 sm:$0xff]  ;;  %v1862_v44 = vpop.f32.mrf.mxu1 }
 0x1d8   : > { %v783_v6 = vpop.xlane.xlu1 %782  ;;  %v930_v9 = vsel %vm437_vm0, %v911_v11, 0.0  ;;  %v786_v36 = vpop.xlane.xlu0 %785 }
 0x1d9   : > { %v868_v42 = vmul.f32 %v2624_v54, %v845_v21  ;;  %v869_v59 = vmul.f32 %v2624_v54, %v846_v38  ;;  %v828_v32 = vmul.f32 %v2692_v16, %v783_v6  ;;  %931 = vadd.xlane.f32.xlu1 %v930_v9  ;;  %v829_v19 = vmul.f32 %v2696_v52, %v786_v36  ;;  %v2726_v6 = vld [vmem:[%s2026_s30 + $0x38] sm:$0xff]  ;;  %v1447_v36 = vpop.f32.mrf.mxu1 }
 0x1da   : > { %v912_v10 = vmul.f32 %v2653_v56, %v2677_v12  ;;  %v913_v22 = vmul.f32 %v2653_v56, %v2680_v40 }
 0x1db   : > { %v847_v20 = vadd.f32 %v828_v32, %v2487_v8  ;;  %v848_v55 = vadd.f32 %v829_v19, %v2484_v34  ;;  %v2708_v25 = vadd.f32 %v2636_v27, %v868_v42  ;;  %v2711_v3 = vadd.f32 %v2636_v27, %v869_v59 }
 0x1dc   : > { %v933_v14 = vsel %vm437_vm0, %v912_v10, 0.0  ;;  %v789_v11 = vpop.xlane.xlu1 %788  ;;  %v936_v8 = vsel %vm437_vm0, %v913_v22, 0.0  ;;  %v792_v41 = vpop.xlane.xlu0 %791  ;;  %v2721_v34 = vmul.f32 %v2716_v1, %v1476_v43  ;;  %v1448_v19 = vadd.f32 %v2685_v15, %v1447_v36  ;;  %v2750_v36 = vld [vmem:[%s2026_s30 + $0x48] sm:$0xff] }
 0x1dd   : > { %v870_v21 = vmul.f32 %v2624_v54, %v847_v20  ;;  %v871_v38 = vmul.f32 %v2624_v54, %v848_v55  ;;  %934 = vadd.xlane.f32.xlu0 %v933_v14  ;;  %v830_v9 = vmul.f32 %v2726_v6, %v789_v11  ;;  %937 = vadd.xlane.f32.xlu1 %v936_v8 }
 0x1de   : > { %3171 = vst [vmem:[#allocation3_spill] sm:$0xff] %v2721_v34  ;;  %v831_v42 = vmul.f32 %v2730_v23, %v792_v41  ;;  %v914_v59 = vmul.f32 %v2653_v56, %v2708_v25  ;;  %v915_v32 = vmul.f32 %v2653_v56, %v2711_v3  ;;  %v1475_v8 = vmax.f32 %v1448_v19, 0.0 }
 0x1df   : > { %v849_v10 = vadd.f32 %v830_v9, %v2508_v49  ;;  %v2740_v22 = vadd.f32 %v2636_v27, %v870_v21  ;;  %v2743_v43 = vadd.f32 %v2636_v27, %v871_v38  ;;  %v2754_v21 = vld [vmem:[%s2026_s30 + $0x50] sm:$0xff] }
 0x1e0   : > { %v850_v20 = vadd.f32 %v831_v42, %v2503_v39  ;;  %v939_v55 = vsel %vm437_vm0, %v914_v59, 0.0  ;;  %v795_v44 = vpop.xlane.xlu1 %794  ;;  %v942_v14 = vsel %vm437_vm0, %v915_v32, 0.0  ;;  %v798_v11 = vpop.xlane.xlu0 %797  ;;  %v2763_v59 = vmul.f32 %v2716_v1, %v1475_v8 }
 0x1e1   : > { %v872_v41 = vmul.f32 %v2624_v54, %v849_v10  ;;  %940 = vadd.xlane.f32.xlu0 %v939_v55  ;;  %v832_v49 = vmul.f32 %v2750_v36, %v795_v44  ;;  %943 = vadd.xlane.f32.xlu1 %v942_v14  ;;  %v833_v38 = vmul.f32 %v2754_v21, %v798_v11 }
 0x1e2   : > { %v873_v39 = vmul.f32 %v2624_v54, %v850_v20  ;;  %v916_v9 = vmul.f32 %v2653_v56, %v2740_v22  ;;  %v917_v42 = vmul.f32 %v2653_v56, %v2743_v43  ;;  %3172 = vst [vmem:[#allocation4_spill] sm:$0xff] %v2763_v59 }
 0x1e3   : > { %v851_v32 = vadd.f32 %v832_v49, %v2523_v60  ;;  %v852_v19 = vadd.f32 %v833_v38, %v2520_v61  ;;  %v2768_v10 = vadd.f32 %v2636_v27, %v872_v41  ;;  %v2778_v60 = vld [vmem:[%s2026_s30 + $0x58] sm:$0xff]  ;;  %v2781_v41 = vpop.f32.mrf.mxu0  ;;  %v2784_v49 = vld [vmem:[%s2026_s30 + $0x60] sm:$0xff] }
 0x1e4   : > { %v945_v55 = vsel %vm437_vm0, %v916_v9, 0.0  ;;  %v801_v20 = vpop.xlane.xlu1 %800  ;;  %v948_v44 = vsel %vm437_vm0, %v917_v42, 0.0  ;;  %v804_v14 = vpop.xlane.xlu0 %803  ;;  %v2773_v11 = vadd.f32 %v2636_v27, %v873_v39  ;;  %3173 = vst [vmem:[#allocation5_spill] sm:$0xff] %v2778_v60  ;;  %3174 = vst [vmem:[#allocation6_spill] sm:$0xff] %v2784_v49 }
 0x1e5   : > { %v874_v8 = vmul.f32 %v2624_v54, %v851_v32  ;;  %v875_v34 = vmul.f32 %v2624_v54, %v852_v19  ;;  %946 = vadd.xlane.f32.xlu0 %v945_v55  ;;  %v834_v61 = vmul.f32 %v2778_v60, %v801_v20  ;;  %949 = vadd.xlane.f32.xlu1 %v948_v44 }
 0x1e6   : > { %v835_v38 = vmul.f32 %v2784_v49, %v804_v14  ;;  %v918_v39 = vmul.f32 %v2653_v56, %v2768_v10  ;;  %v919_v9 = vmul.f32 %v2653_v56, %v2773_v11  ;;  %v2803_v49 = vld [vmem:[%s2026_s30 + $0x68] sm:$0xff] }
 0x1e7   : > { %v853_v42 = vadd.f32 %v834_v61, %v2544_v35  ;;  %v2793_v32 = vadd.f32 %v2636_v27, %v874_v8  ;;  %v2796_v19 = vadd.f32 %v2636_v27, %v875_v34  ;;  %3176 = vst [vmem:[#allocation8_spill] sm:$0xff] %v2803_v49  ;;  %v2807_v8 = vld [vmem:[%s2026_s30 + $0x70] sm:$0xff] }
 0x1e8   : > { %v854_v55 = vadd.f32 %v835_v38, %v2539_v26  ;;  %v951_v20 = vsel %vm437_vm0, %v918_v39, 0.0  ;;  %v807_v44 = vpop.xlane.xlu1 %806  ;;  %v954_v14 = vsel %vm437_vm0, %v919_v9, 0.0  ;;  %v810_v59 = vpop.xlane.xlu0 %809  ;;  %3177 = vst [vmem:[#allocation9_spill] sm:$0xff] %v2807_v8 }
 0x1e9   : > { %3175 = vst [vmem:[#allocation7_spill] sm:$0xff] %v2793_v32  ;;  %v876_v60 = vmul.f32 %v2624_v54, %v853_v42  ;;  %952 = vadd.xlane.f32.xlu0 %v951_v20  ;;  %v836_v35 = vmul.f32 %v2803_v49, %v807_v44  ;;  %955 = vadd.xlane.f32.xlu1 %v954_v14  ;;  %v1380_v26 = vpop.f32.mrf.mxu0 }
 0x1ea   : > { %v837_v34 = vmul.f32 %v2807_v8, %v810_v59  ;;  %v877_v61 = vmul.f32 %v2624_v54, %v854_v55  ;;  %v920_v38 = vmul.f32 %v2653_v56, %v2793_v32  ;;  %v921_v39 = vmul.f32 %v2653_v56, %v2796_v19 }
 0x1eb   : > { %v855_v9 = vadd.f32 %v836_v35, %v2559_v37  ;;  %v2818_v20 = vadd.f32 %v2636_v27, %v876_v60  ;;  %v2828_v37 = vld [vmem:[%s2026_s30 + $0x78] sm:$0xff]  ;;  %v1846_v60 = vpop.f32.mrf.mxu0  ;;  %v2832_v35 = vld [vmem:[%s2026_s30 + $0x80] sm:$0xff] }
 0x1ec   : > { %v856_v42 = vadd.f32 %v837_v34, %v2556_v13  ;;  %v957_v59 = vsel %vm437_vm0, %v920_v38, 0.0  ;;  %v813_v44 = vpop.xlane.xlu1 %812  ;;  %v960_v14 = vsel %vm437_vm0, %v921_v39, 0.0  ;;  %v816_v55 = vpop.xlane.xlu0 %815  ;;  %v2823_v49 = vadd.f32 %v2636_v27, %v877_v61  ;;  %3179 = vst [vmem:[#allocation11_spill] sm:$0xff] %v2828_v37  ;;  %3180 = vst [vmem:[#allocation12_spill] sm:$0xff] %v2832_v35 }
 0x1ed   : > { %3178 = vst [vmem:[#allocation10_spill] sm:$0xff] %v2818_v20  ;;  %v878_v8 = vmul.f32 %v2624_v54, %v855_v9  ;;  %958 = vadd.xlane.f32.xlu0 %v957_v59  ;;  %v838_v13 = vmul.f32 %v2828_v37, %v813_v44  ;;  %961 = vadd.xlane.f32.xlu1 %v960_v14 }
 0x1ee   : > { %v879_v32 = vmul.f32 %v2624_v54, %v856_v42  ;;  %v839_v34 = vmul.f32 %v2832_v35, %v816_v55  ;;  %v922_v61 = vmul.f32 %v2653_v56, %v2818_v20  ;;  %v923_v38 = vmul.f32 %v2653_v56, %v2823_v49  ;;  %v2851_v20 = vld [vmem:[%s2026_s30 + $0x88] sm:$0xff] }
 0x1ef   : > { %v857_v39 = vadd.f32 %v838_v13, %v2580_v58  ;;  %v2841_v9 = vadd.f32 %v2636_v27, %v878_v8  ;;  %3181 = vst [vmem:[#allocation13_spill] sm:$0xff] %v2851_v20  ;;  %v2855_v8 = vld [vmem:[%s2026_s30 + $0x90] sm:$0xff]  ;;  %v1383_v13 = vpop.f32.mrf.mxu0 }
 0x1f0   : > { %v2844_v42 = vadd.f32 %v2636_v27, %v879_v32  ;;  %v858_v59 = vadd.f32 %v839_v34, %v2575_v17  ;;  %v963_v44 = vsel %vm437_vm0, %v922_v61, 0.0  ;;  %v819_v14 = vpop.xlane.xlu1 %818  ;;  %v966_v55 = vsel %vm437_vm0, %v923_v38, 0.0  ;;  %v822_v37 = vpop.xlane.xlu0 %821  ;;  %3182 = vst [vmem:[#allocation14_spill] sm:$0xff] %v2855_v8 }
 0x1f1   : > { %v880_v35 = vmul.f32 %v2624_v54, %v857_v39  ;;  %964 = vadd.xlane.f32.xlu0 %v963_v44  ;;  %v840_v58 = vmul.f32 %v2851_v20, %v819_v14  ;;  %967 = vadd.xlane.f32.xlu1 %v966_v55  ;;  %v841_v32 = vmul.f32 %v2855_v8, %v822_v37 }
 0x1f2   : > { %v881_v17 = vmul.f32 %v2624_v54, %v858_v59  ;;  %v924_v34 = vmul.f32 %v2653_v56, %v2841_v9  ;;  %v925_v61 = vmul.f32 %v2653_v56, %v2844_v42  ;;  %v1381_v14 = vadd.f32 %v2685_v15, %v1380_v26 }
 0x1f3   : > { %v859_v38 = vadd.f32 %v840_v58, %v2593_v28  ;;  %v860_v39 = vadd.f32 %v841_v32, %v2590_v29  ;;  %v2866_v44 = vadd.f32 %v2636_v27, %v880_v35  ;;  %v1384_v20 = vadd.f32 %v2685_v15, %v1383_v13 }
 0x1f4   : > { %v969_v37 = vsel %vm437_vm0, %v924_v34, 0.0  ;;  %v972_v55 = vsel %vm437_vm0, %v925_v61, 0.0  ;;  %v2872_v59 = vadd.f32 %v2636_v27, %v881_v17  ;;  %v1458_v17 = vmax.f32 %v1381_v14, 0.0 }
 0x1f5   : > { %v882_v8 = vmul.f32 %v2624_v54, %v859_v38  ;;  %v883_v28 = vmul.f32 %v2624_v54, %v860_v39  ;;  %970 = vadd.xlane.f32.xlu0 %v969_v37  ;;  %973 = vadd.xlane.f32.xlu1 %v972_v55  ;;  %v926_v29 = vmul.f32 %v2653_v56, %v2866_v44  ;;  %v1459_v38 = vmax.f32 %v1384_v20, 0.0 }
 0x1f6   : > { %v927_v26 = vmul.f32 %v2653_v56, %v2872_v59  ;;  %v1389_v54 = vadd.f32 %v2781_v41, %v2685_v15  ;;  %v1567_v55 = vmul.f32 %v2716_v1, %v1458_v17  ;;  %v1397_v14 = vadd.f32 %v2685_v15, %v2604_v0 }
 0x1f7   : > { %v975_v35 = vsel %vm437_vm0, %v926_v29, 0.0  ;;  %v2883_v58 = vadd.f32 %v2636_v27, %v882_v8  ;;  %v2886_v32 = vadd.f32 %v2636_v27, %v883_v28  ;;  %v1392_v8 = vadd.f32 %v1846_v60, %v2685_v15 }
 0x1f8   : > { %v978_v13 = vsel %vm437_vm0, %v927_v26, 0.0  ;;  %v1460_v37 = vmax.f32 %v1389_v54, 0.0  ;;  %v1568_v28 = vmul.f32 %v2716_v1, %v1459_v38  ;;  %v1405_v20 = vadd.f32 %v2602_v48, %v2685_v15 }
 0x1f9   : > { %976 = vadd.xlane.f32.xlu0 %v975_v35  ;;  %979 = vadd.xlane.f32.xlu1 %v978_v13  ;;  %v928_v34 = vmul.f32 %v2653_v56, %v2883_v58  ;;  %v929_v61 = vmul.f32 %v2653_v56, %v2886_v32  ;;  %v1461_v41 = vmax.f32 %v1392_v8, 0.0  ;;  %v1400_v56 = vadd.f32 %v2685_v15, %v2608_v4 }
 0x1fa   : > { %v1569_v60 = vmul.f32 %v2716_v1, %v1460_v37  ;;  %v1462_v29 = vmax.f32 %v1397_v14, 0.0  ;;  %v1408_v26 = vadd.f32 %v2606_v31, %v2685_v15  ;;  %v1464_v0 = vmax.f32 %v1405_v20, 0.0 }
 0x1fb   : > { %v981_v27 = vsel %vm437_vm0, %v928_v34, 0.0  ;;  %v984_v39 = vsel %vm437_vm0, %v929_v61, 0.0  ;;  %v1463_v35 = vmax.f32 %v1400_v56, 0.0  ;;  %v1570_v13 = vmul.f32 %v2716_v1, %v1461_v41 }
 0x1fc   : > { %v1413_v54 = vadd.f32 %v2685_v15, %v2612_v47  ;;  %v1465_v17 = vmax.f32 %v1408_v26, 0.0  ;;  %v1571_v4 = vmul.f32 %v2716_v1, %v1462_v29  ;;  %v1416_v34 = vadd.f32 %v2685_v15, %v2616_v45 }
 0x1fd   : > { %982 = vadd.xlane.f32.xlu0 %v981_v27  ;;  %985 = vadd.xlane.f32.xlu1 %v984_v39  ;;  %v1572_v48 = vmul.f32 %v2716_v1, %v1463_v35  ;;  %v1421_v31 = vadd.f32 %v2610_v51, %v2685_v15  ;;  %v1424_v8 = vadd.f32 %v2614_v7, %v2685_v15 }
 0x1fe   : > { %v1466_v61 = vmax.f32 %v1413_v54, 0.0  ;;  %v1467_v47 = vmax.f32 %v1416_v34, 0.0  ;;  %v1574_v38 = vmul.f32 %v2716_v1, %v1465_v17  ;;  %v1573_v27 = vmul.f32 %v2716_v1, %v1464_v0  ;;  %v1917_v17 = vld [vmem:[%s3151_s2] sm:$0xf] }
 0x1ff   : > { %v1468_v39 = vmax.f32 %v1421_v31, 0.0  ;;  %v1429_v51 = vadd.f32 %v2685_v15, %v2620_v18  ;;  %v1432_v7 = vadd.f32 %v2685_v15, %v2660_v24  ;;  %v1437_v41 = vadd.f32 %v2618_v62, %v2685_v15 }
 0x200   : > { %v1575_v37 = vmul.f32 %v2716_v1, %v1466_v61  ;;  %v1576_v45 = vmul.f32 %v2716_v1, %v1467_v47  ;;  %v1440_v56 = vadd.f32 %v2638_v57, %v2685_v15  ;;  %v1445_v62 = vadd.f32 %v2685_v15, %v2699_v33 }
 0x201   : > { %1588 = vadd.xlane.f32.xlu0 %v1568_v28  ;;  %1586 = vadd.xlane.f32.xlu1 %v1567_v55  ;;  %v1469_v55 = vmax.f32 %v1424_v8, 0.0  ;;  %v1577_v14 = vmul.f32 %v2716_v1, %v1468_v39  ;;  %v1470_v28 = vmax.f32 %v1429_v51, 0.0  ;;  %v1471_v20 = vmax.f32 %v1432_v7, 0.0 }
 0x202   : > { %v1472_v18 = vmax.f32 %v1437_v41, 0.0  ;;  %v1473_v29 = vmax.f32 %v1440_v56, 0.0 }
 0x203   : > { %v1580_v24 = vmul.f32 %v2716_v1, %v1471_v20  ;;  %v1579_v26 = vmul.f32 %v2716_v1, %v1470_v28 }
 0x204   : > { %v1582_v57 = vmul.f32 %v2716_v1, %v1473_v29  ;;  %v1581_v35 = vmul.f32 %v2716_v1, %v1472_v18 }
 0x205   : > { %1592 = vadd.xlane.f32.xlu0 %v1570_v13  ;;  %1590 = vadd.xlane.f32.xlu1 %v1569_v60  ;;  %v1578_v60 = vmul.f32 %v2716_v1, %v1469_v55  ;;  %v1474_v13 = vmax.f32 %v1445_v62, 0.0 }
 0x207   : > { %v1583_v0 = vmul.f32 %v2716_v1, %v1474_v13 }
 0x209   : > { %1596 = vadd.xlane.f32.xlu0 %v1572_v48  ;;  %1594 = vadd.xlane.f32.xlu1 %v1571_v4  ;;  %v2945_v48 = vrot.slane %v1917_v17, %v2631_v53  ;;  %v1918_v4 = vld [vmem:[%s3152_s3] sm:$0xf] }
 0x20a   : > { %v2953_v34 = vrot.slane %v1918_v4, %v2631_v53 }
 0x20d   : > { %1600 = vadd.xlane.f32.xlu0 %v1574_v38  ;;  %1598 = vadd.xlane.f32.xlu1 %v1573_v27  ;;  %v2964_v27 = vld [vmem:[%s3157_s8] ss:$0 sm:$0xff] }
 0x211   : > { %1604 = vadd.xlane.f32.xlu0 %v1576_v45  ;;  %1602 = vadd.xlane.f32.xlu1 %v1575_v37 }
 0x215   : > { %1608 = vadd.xlane.f32.xlu0 %v1578_v60  ;;  %1606 = vadd.xlane.f32.xlu1 %v1577_v14 }
 0x219   : > { %1612 = vadd.xlane.f32.xlu0 %v1580_v24  ;;  %1610 = vadd.xlane.f32.xlu1 %v1579_v26 }
 0x21d   : > { %1616 = vadd.xlane.f32.xlu0 %v1582_v57  ;;  %1614 = vadd.xlane.f32.xlu1 %v1581_v35 }
 0x221   : > { %1618 = vadd.xlane.f32.xlu1 %v1583_v0 }
 0x262   : > { %v932_v54 = vpop.xlane.xlu1 %931 }
 0x263   : > { %v987_v15 = vmul.f32 %v2627_v30, %v932_v54 }
 0x265   : > { %v1006_v33 = vadd.f32 %v987_v15, %v2658_v46 }
 0x266   : > { %v938_v1 = vpop.xlane.xlu1 %937  ;;  %v935_v31 = vpop.xlane.xlu0 %934 }
 0x267   : > { %v1029_v61 = vmul.f32 %v2945_v48, %v1006_v33  ;;  %v989_v8 = vmul.f32 %v2646_v2, %v938_v1  ;;  %v988_v47 = vmul.f32 %v2642_v63, %v935_v31 }
 0x269   : > { %v1008_v38 = vadd.f32 %v989_v8, %v2680_v40  ;;  %v1007_v30 = vadd.f32 %v988_v47, %v2677_v12  ;;  %v1052_v46 = vadd.f32 %v2953_v34, %v1029_v61 }
 0x26a   : > { %v944_v53 = vpop.xlane.xlu1 %943  ;;  %v941_v39 = vpop.xlane.xlu0 %940 }
 0x26b   : > { %v1031_v37 = vmul.f32 %v2945_v48, %v1008_v38  ;;  %v1030_v55 = vmul.f32 %v2945_v48, %v1007_v30  ;;  %v991_v2 = vmul.f32 %v2669_v50, %v944_v53  ;;  %v990_v63 = vmul.f32 %v2665_v5, %v941_v39  ;;  %v3183_v30 = vld [vmem:[#allocation7_spill] sm:$0xff] }
 0x26c   : > { %v1484_v40 = vmul.f32 %v2964_v27, %v1052_v46 }
 0x26d   : > { %v1010_v12 = vadd.f32 %v991_v2, %v2711_v3  ;;  %v1009_v51 = vadd.f32 %v990_v63, %v2708_v25  ;;  %v1054_v45 = vadd.f32 %v2953_v34, %v1031_v37  ;;  %v1053_v7 = vadd.f32 %v2953_v34, %v1030_v55 }
 0x26e   : > { %v1503_v41 = vsel %vm437_vm0, %v1484_v40, 0.0  ;;  %v950_v14 = vpop.xlane.xlu1 %949  ;;  %v947_v28 = vpop.xlane.xlu0 %946  ;;  %v3184_v40 = vld [vmem:[#allocation6_spill] sm:$0xff] }
 0x26f   : > { %v1033_v56 = vmul.f32 %v2945_v48, %v1010_v12  ;;  %v1032_v50 = vmul.f32 %v2945_v48, %v1009_v51  ;;  %1504 = vadd.xlane.f32.xlu0 %v1503_v41  ;;  %v993_v5 = vmul.f32 %v2696_v52, %v950_v14  ;;  %v992_v20 = vmul.f32 %v2692_v16, %v947_v28 }
 0x270   : > { %v1486_v3 = vmul.f32 %v2964_v27, %v1054_v45  ;;  %v1485_v25 = vmul.f32 %v2964_v27, %v1053_v7 }
 0x271   : > { %v1012_v60 = vadd.f32 %v993_v5, %v2743_v43  ;;  %v1011_v18 = vadd.f32 %v992_v20, %v2740_v22  ;;  %v1056_v29 = vadd.f32 %v2953_v34, %v1033_v56  ;;  %v1055_v24 = vadd.f32 %v2953_v34, %v1032_v50  ;;  %v3186_v56 = vld [vmem:[#allocation10_spill] sm:$0xff] }
 0x272   : > { %v1509_v26 = vsel %vm437_vm0, %v1486_v3, 0.0  ;;  %v956_v62 = vpop.xlane.xlu1 %955  ;;  %v1506_v57 = vsel %vm437_vm0, %v1485_v25, 0.0  ;;  %v953_v52 = vpop.xlane.xlu0 %952 }
 0x273   : > { %v1035_v16 = vmul.f32 %v2945_v48, %v1012_v60  ;;  %v1034_v35 = vmul.f32 %v2945_v48, %v1011_v18  ;;  %1510 = vadd.xlane.f32.xlu0 %v1509_v26  ;;  %v995_v13 = vmul.f32 %v2730_v23, %v956_v62  ;;  %1507 = vadd.xlane.f32.xlu1 %v1506_v57  ;;  %v3187_v18 = vld [vmem:[#allocation9_spill] sm:$0xff] }
 0x274   : > { %v994_v22 = vmul.f32 %v2726_v6, %v953_v52  ;;  %v1488_v43 = vmul.f32 %v2964_v27, %v1056_v29  ;;  %v1487_v0 = vmul.f32 %v2964_v27, %v1055_v24  ;;  %v3188_v24 = vld [vmem:[#allocation8_spill] sm:$0xff] }
 0x275   : > { %v1014_v54 = vadd.f32 %v995_v13, %v2773_v11  ;;  %v1058_v17 = vadd.f32 %v2953_v34, %v1035_v16  ;;  %v1057_v15 = vadd.f32 %v2953_v34, %v1034_v35 }
 0x276   : > { %v1013_v33 = vadd.f32 %v994_v22, %v2768_v10  ;;  %v1515_v4 = vsel %vm437_vm0, %v1488_v43, 0.0  ;;  %v962_v1 = vpop.xlane.xlu1 %961  ;;  %v1512_v23 = vsel %vm437_vm0, %v1487_v0, 0.0  ;;  %v959_v31 = vpop.xlane.xlu0 %958 }
 0x277   : > { %v1037_v6 = vmul.f32 %v2945_v48, %v1014_v54  ;;  %1516 = vadd.xlane.f32.xlu0 %v1515_v4  ;;  %v997_v61 = vmul.f32 %v2754_v21, %v962_v1  ;;  %1513 = vadd.xlane.f32.xlu1 %v1512_v23  ;;  %v996_v11 = vmul.f32 %v2750_v36, %v959_v31 }
 0x278   : > { %v1036_v8 = vmul.f32 %v2945_v48, %v1013_v33  ;;  %v1490_v47 = vmul.f32 %v2964_v27, %v1058_v17  ;;  %v1489_v10 = vmul.f32 %v2964_v27, %v1057_v15  ;;  %v3189_v33 = vld [vmem:[#allocation12_spill] sm:$0xff] }
 0x279   : > { %v1016_v38 = vadd.f32 %v997_v61, %v2796_v19  ;;  %v1015_v46 = vadd.f32 %v996_v11, %v3183_v30  ;;  %v1060_v53 = vadd.f32 %v2953_v34, %v1037_v6  ;;  %v3185_v19 = vld [vmem:[#allocation5_spill] sm:$0xff] }
 0x27a   : > { %v1521_v39 = vsel %vm437_vm0, %v1490_v47, 0.0  ;;  %v968_v37 = vpop.xlane.xlu1 %967  ;;  %v1518_v21 = vsel %vm437_vm0, %v1489_v10, 0.0  ;;  %v965_v55 = vpop.xlane.xlu0 %964  ;;  %v1059_v36 = vadd.f32 %v2953_v34, %v1036_v8 }
 0x27b   : > { %v1039_v2 = vmul.f32 %v2945_v48, %v1016_v38  ;;  %v1038_v63 = vmul.f32 %v2945_v48, %v1015_v46  ;;  %1522 = vadd.xlane.f32.xlu0 %v1521_v39  ;;  %v999_v12 = vmul.f32 %v3184_v40, %v968_v37  ;;  %1519 = vadd.xlane.f32.xlu1 %v1518_v21  ;;  %v3191_v46 = vld [vmem:[#allocation14_spill] sm:$0xff]  ;;  %v3192_v39 = vld [vmem:[#allocation13_spill] sm:$0xff] }
 0x27c   : > { %v998_v51 = vmul.f32 %v3185_v19, %v965_v55  ;;  %v1492_v45 = vmul.f32 %v2964_v27, %v1060_v53  ;;  %v1491_v7 = vmul.f32 %v2964_v27, %v1059_v36 }
 0x27d   : > { %v1018_v41 = vadd.f32 %v999_v12, %v2823_v49  ;;  %v1062_v14 = vadd.f32 %v2953_v34, %v1039_v2  ;;  %v1061_v28 = vadd.f32 %v2953_v34, %v1038_v63 }
 0x27e   : > { %v1017_v50 = vadd.f32 %v998_v51, %v3186_v56  ;;  %v1527_v5 = vsel %vm437_vm0, %v1492_v45, 0.0  ;;  %v974_v20 = vpop.xlane.xlu1 %973  ;;  %v1524_v3 = vsel %vm437_vm0, %v1491_v7, 0.0  ;;  %v971_v25 = vpop.xlane.xlu0 %970 }
 0x27f   : > { %v1041_v60 = vmul.f32 %v2945_v48, %v1018_v41  ;;  %1528 = vadd.xlane.f32.xlu0 %v1527_v5  ;;  %v1001_v29 = vmul.f32 %v3187_v18, %v974_v20  ;;  %1525 = vadd.xlane.f32.xlu1 %v1524_v3  ;;  %v1000_v49 = vmul.f32 %v3188_v24, %v971_v25  ;;  %v3193_v5 = vld [vmem:[#allocation4_spill] sm:$0xff]  ;;  %v3194_v20 = vld [vmem:[#allocation3_spill] sm:$0xff] }
 0x280   : > { %v1040_v26 = vmul.f32 %v2945_v48, %v1017_v50  ;;  %v1494_v62 = vmul.f32 %v2964_v27, %v1062_v14  ;;  %v1493_v57 = vmul.f32 %v2964_v27, %v1061_v28 }
 0x281   : > { %v1020_v52 = vadd.f32 %v1001_v29, %v2844_v42  ;;  %v1019_v16 = vadd.f32 %v1000_v49, %v2841_v9  ;;  %v1064_v35 = vadd.f32 %v2953_v34, %v1041_v60  ;;  %v3190_v42 = vld [vmem:[#allocation11_spill] sm:$0xff] }
 0x282   : > { %v1533_v13 = vsel %vm437_vm0, %v1494_v62, 0.0  ;;  %v980_v22 = vpop.xlane.xlu1 %979  ;;  %v1530_v43 = vsel %vm437_vm0, %v1493_v57, 0.0  ;;  %v977_v0 = vpop.xlane.xlu0 %976  ;;  %v1063_v54 = vadd.f32 %v2953_v34, %v1040_v26 }
 0x283   : > { %v1043_v17 = vmul.f32 %v2945_v48, %v1020_v52  ;;  %v1042_v15 = vmul.f32 %v2945_v48, %v1019_v16  ;;  %1534 = vadd.xlane.f32.xlu0 %v1533_v13  ;;  %v1003_v4 = vmul.f32 %v3189_v33, %v980_v22  ;;  %1531 = vadd.xlane.f32.xlu1 %v1530_v43  ;;  %v3078_v43 = vstv %s1643_s13 }
 0x284   : > { %v1002_v9 = vmul.f32 %v3190_v42, %v977_v0  ;;  %v1496_v1 = vmul.f32 %v2964_v27, %v1064_v35  ;;  %v1495_v23 = vmul.f32 %v2964_v27, %v1063_v54 }
 0x285   : > { %v1022_v31 = vadd.f32 %v1003_v4, %v2872_v59  ;;  %v1066_v6 = vadd.f32 %v2953_v34, %v1043_v17  ;;  %v1065_v61 = vadd.f32 %v2953_v34, %v1042_v15 }
 0x286   : > { %v1021_v11 = vadd.f32 %v1002_v9, %v2866_v44  ;;  %v1539_v8 = vsel %vm437_vm0, %v1496_v1, 0.0  ;;  %v986_v47 = vpop.xlane.xlu1 %985  ;;  %v1536_v10 = vsel %vm437_vm0, %v1495_v23, 0.0  ;;  %v983_v38 = vpop.xlane.xlu0 %982 }
 0x287   : > { %v1045_v30 = vmul.f32 %v2945_v48, %v1022_v31  ;;  %1540 = vadd.xlane.f32.xlu0 %v1539_v8  ;;  %v1005_v53 = vmul.f32 %v3191_v46, %v986_v47  ;;  %1537 = vadd.xlane.f32.xlu1 %v1536_v10  ;;  %v1004_v59 = vmul.f32 %v3192_v39, %v983_v38 }
 0x288   : > { %v1044_v37 = vmul.f32 %v2945_v48, %v1021_v11  ;;  %v1498_v21 = vmul.f32 %v2964_v27, %v1066_v6  ;;  %v1497_v44 = vmul.f32 %v2964_v27, %v1065_v61 }
 0x289   : > { %v1024_v55 = vadd.f32 %v1005_v53, %v2886_v32  ;;  %v1023_v36 = vadd.f32 %v1004_v59, %v2883_v58  ;;  %v1068_v2 = vadd.f32 %v2953_v34, %v1045_v30 }
 0x28a   : > { %v1545_v63 = vsel %vm437_vm0, %v1498_v21, 0.0  ;;  %v1542_v40 = vsel %vm437_vm0, %v1497_v44, 0.0  ;;  %v1067_v12 = vadd.f32 %v2953_v34, %v1044_v37  ;;  %v1587_v3 = vpop.xlane.xlu1 %1586 }
 0x28b   : > { %v1047_v19 = vmul.f32 %v2945_v48, %v1024_v55  ;;  %v1046_v51 = vmul.f32 %v2945_v48, %v1023_v36  ;;  %1546 = vadd.xlane.f32.xlu0 %v1545_v63  ;;  %1543 = vadd.xlane.f32.xlu1 %v1542_v40  ;;  %v1500_v45 = vmul.f32 %v2964_v27, %v1068_v2 }
 0x28c   : > { %v1499_v32 = vmul.f32 %v2964_v27, %v1067_v12 }
 0x28d   : > { %v1551_v58 = vsel %vm437_vm0, %v1500_v45, 0.0  ;;  %v1070_v7 = vadd.f32 %v2953_v34, %v1047_v19  ;;  %v1069_v41 = vadd.f32 %v2953_v34, %v1046_v51  ;;  %v1589_v34 = vpop.xlane.xlu0 %1588 }
 0x28e   : > { %v1548_v14 = vsel %vm437_vm0, %v1499_v32, 0.0  ;;  %v1591_v25 = vpop.xlane.xlu1 %1590 }
 0x28f   : > { %1552 = vadd.xlane.f32.xlu0 %v1551_v58  ;;  %1549 = vadd.xlane.f32.xlu1 %v1548_v14  ;;  %v1502_v28 = vmul.f32 %v2964_v27, %v1070_v7  ;;  %v1501_v48 = vmul.f32 %v2964_v27, %v1069_v41 }
 0x291   : > { %v1557_v56 = vsel %vm437_vm0, %v1502_v28, 0.0  ;;  %v1554_v50 = vsel %vm437_vm0, %v1501_v48, 0.0  ;;  %v1593_v60 = vpop.xlane.xlu0 %1592 }
 0x292   : > { %v1595_v18 = vpop.xlane.xlu1 %1594 }
 0x293   : > { %1558 = vadd.xlane.f32.xlu0 %v1557_v56  ;;  %1555 = vadd.xlane.f32.xlu1 %v1554_v50 }
 0x295   : > { %v1597_v29 = vpop.xlane.xlu0 %1596 }
 0x296   : > { %v1599_v24 = vpop.xlane.xlu1 %1598 }
 0x297   : > { %1620 = vadd.xlane.f32.xlu0 %v3193_v5  ;;  %1622 = vadd.xlane.f32.xlu1 %v3194_v20 }
 0x299   : > { %v1601_v49 = vpop.xlane.xlu0 %1600 }
 0x29a   : > { %v1603_v27 = vpop.xlane.xlu1 %1602 }
 0x29d   : > { %v1605_v26 = vpop.xlane.xlu0 %1604 }
 0x29e   : > { %v1607_v62 = vpop.xlane.xlu1 %1606 }
 0x2a1   : > { %v1609_v57 = vpop.xlane.xlu0 %1608 }
 0x2a2   : > { %v1611_v52 = vpop.xlane.xlu1 %1610 }
 0x2a5   : > { %v1613_v16 = vpop.xlane.xlu0 %1612 }
 0x2a6   : > { %v1615_v35 = vpop.xlane.xlu1 %1614 }
 0x2a9   : > { %v3074_v13 = vpop.xlane.xlu0 %1616 }
 0x2aa   : > { %v3076_v22 = vpop.xlane.xlu1 %1618 }
 0x2f8   : > { %v1505_v0 = vpop.xlane.xlu0 %1504 }
 0x2f9   : > { %v1624_v54 = vadd.f32 %v1587_v3, %v1505_v0 }
 0x2fb   : > { %v1645_v17 = vadd.f32 %v3078_v43, %v1624_v54 }
 0x2fc   : > { %v1508_v15 = vpop.xlane.xlu1 %1507  ;;  %v1511_v33 = vpop.xlane.xlu0 %1510 }
 0x2fd   : > { %1665 = vst.msk [vmem:[%s3085_s16] sm:$0xff] %vm1664_vm1, %v1645_v17  ;;  %v1625_v4 = vadd.f32 %v1589_v34, %v1508_v15  ;;  %v1626_v42 = vadd.f32 %v1591_v25, %v1511_v33 }
 0x2ff   : > { %v1646_v9 = vadd.f32 %v3078_v43, %v1625_v4  ;;  %v1647_v1 = vadd.f32 %v3078_v43, %v1626_v42 }
 0x300   : > { %v1514_v23 = vpop.xlane.xlu1 %1513  ;;  %v1517_v31 = vpop.xlane.xlu0 %1516 }
 0x301   : > { %1666 = vst.msk [vmem:[%s3085_s16 + $0x8] sm:$0xff] %vm1664_vm1, %v1646_v9  ;;  %1667 = vst.msk [vmem:[%s3085_s16 + $0x10] sm:$0xff] %vm1664_vm1, %v1647_v1  ;;  %v1627_v6 = vadd.f32 %v1593_v60, %v1514_v23  ;;  %v1628_v61 = vadd.f32 %v1595_v18, %v1517_v31 }
 0x303   : > { %v1648_v11 = vadd.f32 %v3078_v43, %v1627_v6  ;;  %v1649_v8 = vadd.f32 %v3078_v43, %v1628_v61 }
 0x304   : > { %v1520_v47 = vpop.xlane.xlu1 %1519  ;;  %v1523_v10 = vpop.xlane.xlu0 %1522 }
 0x305   : > { %1668 = vst.msk [vmem:[%s3085_s16 + $0x18] sm:$0xff] %vm1664_vm1, %v1648_v11  ;;  %1669 = vst.msk [vmem:[%s3085_s16 + $0x20] sm:$0xff] %vm1664_vm1, %v1649_v8  ;;  %v1629_v38 = vadd.f32 %v1597_v29, %v1520_v47  ;;  %v1630_v30 = vadd.f32 %v1599_v24, %v1523_v10 }
 0x307   : > { %v1650_v46 = vadd.f32 %v3078_v43, %v1629_v38  ;;  %v1651_v53 = vadd.f32 %v3078_v43, %v1630_v30 }
 0x308   : > { %v1526_v39 = vpop.xlane.xlu1 %1525  ;;  %v1529_v59 = vpop.xlane.xlu0 %1528 }
 0x309   : > { %1670 = vst.msk [vmem:[%s3085_s16 + $0x28] sm:$0xff] %vm1664_vm1, %v1650_v46  ;;  %1671 = vst.msk [vmem:[%s3085_s16 + $0x30] sm:$0xff] %vm1664_vm1, %v1651_v53  ;;  %v1631_v37 = vadd.f32 %v1601_v49, %v1526_v39  ;;  %v1632_v21 = vadd.f32 %v1603_v27, %v1529_v59 }
 0x30b   : > { %v1652_v44 = vadd.f32 %v3078_v43, %v1631_v37  ;;  %v1653_v55 = vadd.f32 %v3078_v43, %v1632_v21 }
 0x30c   : > { %v1532_v36 = vpop.xlane.xlu1 %1531  ;;  %v1535_v2 = vpop.xlane.xlu0 %1534 }
 0x30d   : > { %1672 = vst.msk [vmem:[%s3085_s16 + $0x38] sm:$0xff] %vm1664_vm1, %v1652_v44  ;;  %1673 = vst.msk [vmem:[%s3085_s16 + $0x40] sm:$0xff] %vm1664_vm1, %v1653_v55  ;;  %v1633_v63 = vadd.f32 %v1605_v26, %v1532_v36  ;;  %v1634_v40 = vadd.f32 %v1607_v62, %v1535_v2 }
 0x30f   : > { %v1654_v12 = vadd.f32 %v3078_v43, %v1633_v63  ;;  %v1655_v19 = vadd.f32 %v3078_v43, %v1634_v40 }
 0x310   : > { %v1538_v51 = vpop.xlane.xlu1 %1537  ;;  %v1541_v45 = vpop.xlane.xlu0 %1540 }
 0x311   : > { %1674 = vst.msk [vmem:[%s3085_s16 + $0x48] sm:$0xff] %vm1664_vm1, %v1654_v12  ;;  %1675 = vst.msk [vmem:[%s3085_s16 + $0x50] sm:$0xff] %vm1664_vm1, %v1655_v19  ;;  %v1635_v32 = vadd.f32 %v1609_v57, %v1538_v51  ;;  %v1636_v58 = vadd.f32 %v1611_v52, %v1541_v45 }
 0x313   : > { %v1656_v7 = vadd.f32 %v3078_v43, %v1635_v32  ;;  %v1657_v41 = vadd.f32 %v3078_v43, %v1636_v58 }
 0x314   : > { %v1544_v14 = vpop.xlane.xlu1 %1543  ;;  %v1547_v28 = vpop.xlane.xlu0 %1546 }
 0x315   : > { %1676 = vst.msk [vmem:[%s3085_s16 + $0x58] sm:$0xff] %vm1664_vm1, %v1656_v7  ;;  %1677 = vst.msk [vmem:[%s3085_s16 + $0x60] sm:$0xff] %vm1664_vm1, %v1657_v41  ;;  %v1637_v48 = vadd.f32 %v1613_v16, %v1544_v14  ;;  %v1638_v56 = vadd.f32 %v1615_v35, %v1547_v28 }
 0x317   : > { %v1658_v50 = vadd.f32 %v3078_v43, %v1637_v48  ;;  %v1659_v5 = vadd.f32 %v3078_v43, %v1638_v56 }
 0x318   : > { %v1550_v20 = vpop.xlane.xlu1 %1549  ;;  %v1553_v3 = vpop.xlane.xlu0 %1552 }
 0x319   : > { %1678 = vst.msk [vmem:[%s3085_s16 + $0x68] sm:$0xff] %vm1664_vm1, %v1658_v50  ;;  %1679 = vst.msk [vmem:[%s3085_s16 + $0x70] sm:$0xff] %vm1664_vm1, %v1659_v5  ;;  %v1639_v34 = vadd.f32 %v3074_v13, %v1550_v20  ;;  %v1640_v25 = vadd.f32 %v3076_v22, %v1553_v3 }
 0x31b   : > { %v1660_v60 = vadd.f32 %v3078_v43, %v1639_v34  ;;  %v1661_v18 = vadd.f32 %v3078_v43, %v1640_v25 }
 0x31c   : > { %v1556_v29 = vpop.xlane.xlu1 %1555  ;;  %v1559_v24 = vpop.xlane.xlu0 %1558 }
 0x31d   : > { %1680 = vst.msk [vmem:[%s3085_s16 + $0x78] sm:$0xff] %vm1664_vm1, %v1660_v60  ;;  %1681 = vst.msk [vmem:[%s3085_s16 + $0x80] sm:$0xff] %vm1664_vm1, %v1661_v18 }
 0x320   : > { %v1623_v49 = vpop.xlane.xlu1 %1622  ;;  %v1621_v27 = vpop.xlane.xlu0 %1620 }
 0x321   : > { %v1642_v26 = vadd.f32 %v1623_v49, %v1559_v24  ;;  %v1641_v62 = vadd.f32 %v1621_v27, %v1556_v29 }
 0x323   : > { %v1663_v57 = vadd.f32 %v3078_v43, %v1642_v26  ;;  %v1662_v52 = vadd.f32 %v3078_v43, %v1641_v62 }
 0x325   : > { %1683 = vst.msk [vmem:[%s3085_s16 + $0x90] sm:$0xff] %vm1664_vm1, %v1663_v57  ;;  %1682 = vst.msk [vmem:[%s3085_s16 + $0x88] sm:$0xff] %vm1664_vm1, %v1662_v52 }
 0x326 PF: > { %s22_s19 = sadd.s32 1, %s1925_s19  }
 0x327   : > { %p19_p4 = scmp.ge.s32.totalorder %s22_s19, 4  }
 0x329   :  { %21 = sbr.rel (!%p19_p4) target bundleno = 2 (0x2), region = 94 }

</bundles_post_ra>
